<compile_context>
chip_gen: v7x
topology: tpu7x:2x2x1
jax: 0.10.0
libtpu: 0.0.40
codegen_flags: <defaults>
</compile_context>

<pallas_src>
import math

import jax
import jax.numpy as jnp
from jax import lax
from jax.experimental import pallas as pl
from jax.experimental.pallas import tpu as pltpu


def _mha_kernel(heads, head_dim, q_tile, mask_mode):
    """Kernel closed over static config. One grid step = (batch n, q-tile qi)."""
    scale = 1.0 / math.sqrt(head_dim)
    f32 = jnp.float32
    bf16 = jnp.bfloat16

    def kernel(*refs):
        if mask_mode == "dense":
            (v_ref, k_ref, q_ref, mask_ref,
             wv_ref, bv_ref, wk_ref, bk_ref, wq_ref, bq_ref, wo_ref, bo_ref,
             out_ref, k_scr, v_scr, cat_scr) = refs
        else:
            (v_ref, k_ref, q_ref,
             wv_ref, bv_ref, wk_ref, bk_ref, wq_ref, bq_ref, wo_ref, bo_ref,
             out_ref, k_scr, v_scr, cat_scr) = refs
            mask_ref = None

        qi = pl.program_id(1)

        # --- Project K/V once per batch element, cache as bf16 in VMEM scratch.
        # keys/values block indices do not depend on qi, so their DMA is also
        # skipped for qi > 0; this removes the n_q-fold redundant MXU work.
        @pl.when(qi == 0)
        def _():
            K = jnp.dot(k_ref[0], wk_ref[...], preferred_element_type=f32) + bk_ref[...]
            V = jnp.dot(v_ref[0], wv_ref[...], preferred_element_type=f32) + bv_ref[...]
            k_scr[...] = K.astype(bf16)
            v_scr[...] = V.astype(bf16)

        # --- Q projection; fold the softmax scale in; single bf16 cast.
        Q = jnp.dot(q_ref[0], wq_ref[...], preferred_element_type=f32) + bq_ref[...]
        Q = (Q * f32(scale)).astype(bf16)                       # (tq, E) bf16

        tq = Q.shape[0]
        k_len = k_scr.shape[0]

        # --- Additive mask bias, hoisted out of the head loop.
        if mask_mode == "dense":
            neg_bias = jnp.where(mask_ref[0] == 0, f32(-1e30), f32(0.0))
        elif mask_mode == "causal":
            rows = qi * q_tile + lax.broadcasted_iota(jnp.int32, (tq, k_len), 0)
            cols = lax.broadcasted_iota(jnp.int32, (tq, k_len), 1)
            neg_bias = jnp.where(cols <= rows, f32(0.0), f32(-1e30))
        else:
            neg_bias = None

        # --- Per-head attention. Per-head chunks are loaded from the bf16
        # scratch inside the loop (small live ranges); head outputs go straight
        # into the concat scratch via static lane-slice stores.
        for h in range(heads):
            lo = h * head_dim
            hi = lo + head_dim
            q_h = Q[:, lo:hi]                       # (tq, D)    bf16
            k_h = k_scr[:, lo:hi]                   # (k_len, D) bf16
            v_h = v_scr[:, lo:hi]                   # (k_len, D) bf16

            # energy = q_h @ k_h^T (contract feature axes directly, no .T).
            energy = lax.dot_general(q_h, k_h, (((1,), (1,)), ((), ())),
                                     preferred_element_type=f32)   # (tq, k_len)
            if neg_bias is not None:
                energy = energy + neg_bias

            # Numerically stable softmax over keys, kept in f32 (VPU/EUP).
            e_max = jnp.max(energy, axis=-1, keepdims=True)
            p = jnp.exp(energy - e_max)
            denom = jnp.sum(p, axis=-1, keepdims=True)
            attn = (p * pl.reciprocal(denom, approx=True)).astype(bf16)

            head_out = jnp.dot(attn, v_h, preferred_element_type=f32)  # (tq, D)
            cat_scr[:, lo:hi] = head_out.astype(bf16)

        # --- Single full-depth output projection (MXU-optimal E-deep contraction).
        out = jnp.dot(cat_scr[...], wo_ref[...], preferred_element_type=f32)
        out_ref[0] = (out + bo_ref[...]).astype(out_ref.dtype)

    return kernel


def _pick_q_tile(q_len, max_tile=256):
    """Largest q tile <= max_tile dividing q_len, preferring multiples of 16
    (bf16 sublane packing). On v5e, larger tiles (384-512) can help further."""
    if q_len <= max_tile:
        return q_len
    for t in range(max_tile, 15, -1):
        if q_len % t == 0 and t % 16 == 0:
            return t
    for t in range(max_tile, 7, -1):
        if q_len % t == 0 and t % 8 == 0:
            return t
    return q_len


def self_attention_pallas(values, keys, query, mask, params, heads, *, q_tile=None):
    """values/keys/query: (N, len, E) f32.
    mask: None | "causal" (generated in-kernel) | tensor (N,1,q_len,k_len) / (N,q_len,k_len)."""
    N, q_len, E = query.shape
    v_len = values.shape[1]
    k_len = keys.shape[1]
    head_dim = E // heads
    assert head_dim * heads == E, "Embed size needs to be div by heads"
    assert v_len == k_len, "values and keys must share sequence length"

    if isinstance(mask, str):
        assert mask == "causal"
        mask_mode = "causal"
    elif mask is None:
        mask_mode = "none"
    else:
        mask_mode = "dense"

    # bf16 MXU operands (weights + activations); biases stay f32.
    wv, bv = params["values"]
    wk, bk = params["keys"]
    wq, bq = params["queries"]
    wo, bo = params["fc_out"]
    wv = wv.astype(jnp.bfloat16)
    wk = wk.astype(jnp.bfloat16)
    wq = wq.astype(jnp.bfloat16)
    wo = wo.astype(jnp.bfloat16)
    bv = bv.reshape(1, E).astype(jnp.float32)
    bk = bk.reshape(1, E).astype(jnp.float32)
    bq = bq.reshape(1, E).astype(jnp.float32)
    bo = bo.reshape(1, E).astype(jnp.float32)

    values_bf = values.astype(jnp.bfloat16)
    keys_bf = keys.astype(jnp.bfloat16)
    query_bf = query.astype(jnp.bfloat16)

    tq = q_tile if q_tile is not None else _pick_q_tile(q_len)
    assert q_len % tq == 0, "q_tile must divide q_len"
    n_q = q_len // tq

    kernel = _mha_kernel(heads, head_dim, tq, mask_mode)

    # Weight blocks have constant index maps -> fetched once per call.
    # (At large E consider pipeline_mode=pl.Buffered(1) to drop the 2nd buffer.)
    w_spec = pl.BlockSpec((E, E), lambda n, qi: (0, 0))
    b_spec = pl.BlockSpec((1, E), lambda n, qi: (0, 0))

    in_specs = [
        pl.BlockSpec((1, v_len, E), lambda n, qi: (n, 0, 0)),   # values
        pl.BlockSpec((1, k_len, E), lambda n, qi: (n, 0, 0)),   # keys
        pl.BlockSpec((1, tq, E), lambda n, qi: (n, qi, 0)),     # query
    ]
    args = [values_bf, keys_bf, query_bf]

    if mask_mode == "dense":
        m = jnp.asarray(mask)
        if m.ndim == 4:
            m = m[:, 0]                                         # drop heads-broadcast dim
        m = jnp.broadcast_to(m, (N, q_len, k_len))
        mask_i8 = (m != 0).astype(jnp.int8)                     # nonzero = keep
        in_specs.append(pl.BlockSpec((1, tq, k_len), lambda n, qi: (n, qi, 0)))
        args.append(mask_i8)

    in_specs += [w_spec, b_spec, w_spec, b_spec, w_spec, b_spec, w_spec, b_spec]
    args += [wv, bv, wk, bk, wq, bq, wo, bo]

    # Rough VMEM footprint -> raise the scoped limit (v5e default is only 16 MiB),
    # capped at 64 MiB (v7x physical VMEM).
    est = (
        2 * (2 * k_len * E * 2)      # keys + values blocks, double-buffered bf16
        + 2 * tq * E * 2             # query block, double-buffered bf16
        + 4 * 2 * E * E * 2          # 4 weight blocks, double-buffered bf16
        + 8 * 2 * E * 4              # biases
        + 2 * tq * E * 4             # f32 output block, double-buffered
        + 2 * k_len * E * 2          # K/V bf16 scratch
        + tq * E * 2                 # concat bf16 scratch
        + 4 * tq * k_len * 4         # per-head f32 score intermediates (headroom)
    )
    if mask_mode == "dense":
        est += 2 * tq * k_len
    vmem_limit = int(min(max(2 * est, 32 * 1024 * 1024), 64 * 1024 * 1024))

    return pl.pallas_call(
        kernel,
        out_shape=jax.ShapeDtypeStruct((N, q_len, E), jnp.float32),
        grid_spec=pltpu.PrefetchScalarGridSpec(
            num_scalar_prefetch=0,
            grid=(N, n_q),
            in_specs=in_specs,
            out_specs=pl.BlockSpec((1, tq, E), lambda n, qi: (n, qi, 0)),
            scratch_shapes=[
                pltpu.VMEM((k_len, E), jnp.bfloat16),   # projected K cache
                pltpu.VMEM((k_len, E), jnp.bfloat16),   # projected V cache
                pltpu.VMEM((tq, E), jnp.bfloat16),      # concatenated head outputs
            ],
        ),
        # qi must be "arbitrary": the K/V scratch cache requires qi iterations of
        # a given n to run sequentially on one core starting at qi == 0.
        compiler_params=pltpu.CompilerParams(
            dimension_semantics=("parallel", "arbitrary"),
            vmem_limit_bytes=vmem_limit,
        ),
    )(*args)


def self_attention_ref(values, keys, query, mask, params, heads):
    """Pure-JAX f32 reference mirroring the PyTorch forward exactly."""
    N, q_len, E = query.shape
    head_dim = E // heads

    def lin(x, wb):
        w, b = wb
        return x @ w + b

    V = lin(values, params["values"])
    K = lin(keys, params["keys"])
    Q = lin(query, params["queries"])

    V = V.reshape(N, -1, heads, head_dim)
    K = K.reshape(N, -1, heads, head_dim)
    Q = Q.reshape(N, -1, heads, head_dim)

    energy = jnp.einsum("nqhd,nkhd->nhqk", Q, K)
    if mask is not None:
        energy = jnp.where(mask == 0, jnp.float32(-1e20), energy)
    attn = jax.nn.softmax(energy / math.sqrt(head_dim), axis=3)
    out = jnp.einsum("nhqk,nkhd->nqhd", attn, V)
    out = out.reshape(N, q_len, E)
    return lin(out, params["fc_out"])


def init_params(key, embed_size):
    """Deterministic nn.Linear-style init; weights stored as (E_in, E_out)."""
    ks = jax.random.split(key, 8)
    bound = 1.0 / math.sqrt(embed_size)

    def linear(kw, kb):
        w = jax.random.uniform(kw, (embed_size, embed_size), jnp.float32, -bound, bound)
        b = jax.random.uniform(kb, (embed_size,), jnp.float32, -bound, bound)
        return (w, b)

    return {
        "values": linear(ks[0], ks[1]),
        "keys": linear(ks[2], ks[3]),
        "queries": linear(ks[4], ks[5]),
        "fc_out": linear(ks[6], ks[7]),
    }


if __name__ == "__main__":
    # Lane-dense config: E multiple of 128; seq chosen so multiple q tiles
    # exercise the qi==0 K/V projection caching.
    N, seq, embed_size, heads = 2, 64, 128, 4

    key = jax.random.PRNGKey(0)
    k_params, k_v, k_k, k_q = jax.random.split(key, 4)

    params = init_params(k_params, embed_size)
    values = jax.random.normal(k_v, (N, seq, embed_size), jnp.float32)
    keys = jax.random.normal(k_k, (N, seq, embed_size), jnp.float32)
    query = jax.random.normal(k_q, (N, seq, embed_size), jnp.float32)

    # Dense causal mask (nonzero = keep), broadcast over heads like the PyTorch usage.
    causal = jnp.tril(jnp.ones((seq, seq), jnp.float32))
    mask = jnp.broadcast_to(causal, (N, 1, seq, seq))

    ref_causal = self_attention_ref(values, keys, query, mask, params, heads)
    ref_nomask = self_attention_ref(values, keys, query, None, params, heads)

    # 1) Causal mask generated in-kernel (zero mask HBM traffic); q tiled so the
    #    K/V scratch cache is revisited across q tiles.
    out = jax.block_until_ready(
        self_attention_pallas(values, keys, query, "causal", params, heads, q_tile=32))
    assert out.shape == ref_causal.shape
    err = jnp.max(jnp.abs(out - ref_causal))
    assert jnp.allclose(out, ref_causal, atol=5e-2, rtol=5e-2), (
        f"causal (in-kernel mask) mismatch vs reference, max abs err = {err}")

    # 2) Arbitrary dense mask tensor, matching the PyTorch module signature.
    out_d = jax.block_until_ready(
        self_attention_pallas(values, keys, query, mask, params, heads))
    err_d = jnp.max(jnp.abs(out_d - ref_causal))
    assert jnp.allclose(out_d, ref_causal, atol=5e-2, rtol=5e-2), (
        f"dense-mask mismatch vs reference, max abs err = {err_d}")

    # 3) mask=None: compiled without any mask input or bias add.
    out_n = jax.block_until_ready(
        self_attention_pallas(values, keys, query, None, params, heads))
    err_n = jnp.max(jnp.abs(out_n - ref_nomask))
    assert jnp.allclose(out_n, ref_nomask, atol=5e-2, rtol=5e-2), (
        f"no-mask mismatch vs reference, max abs err = {err_n}")

    print("KERNEL_OK")
</pallas_src>

<mosaic_0001>
module attributes {stable_mosaic.version = 11 : i64} {
  func.func @kernel(%arg0: i32, %arg1: i32, %arg2: memref<1x64x128xbf16, #tpu.memory_space<vmem>>, %arg3: memref<1x64x128xbf16, #tpu.memory_space<vmem>>, %arg4: memref<1x32x128xbf16, #tpu.memory_space<vmem>>, %arg5: memref<128x128xbf16, #tpu.memory_space<vmem>>, %arg6: memref<1x128xf32, #tpu.memory_space<vmem>>, %arg7: memref<128x128xbf16, #tpu.memory_space<vmem>>, %arg8: memref<1x128xf32, #tpu.memory_space<vmem>>, %arg9: memref<128x128xbf16, #tpu.memory_space<vmem>>, %arg10: memref<1x128xf32, #tpu.memory_space<vmem>>, %arg11: memref<128x128xbf16, #tpu.memory_space<vmem>>, %arg12: memref<1x128xf32, #tpu.memory_space<vmem>>, %arg13: memref<1x32x128xf32, #tpu.memory_space<vmem>>, %arg14: memref<64x128xbf16, #tpu.memory_space<vmem>>, %arg15: memref<64x128xbf16, #tpu.memory_space<vmem>>, %arg16: memref<32x128xbf16, #tpu.memory_space<vmem>>) attributes {dimension_semantics = [#tpu.dimension_semantics<parallel>, #tpu.dimension_semantics<arbitrary>], iteration_bounds = array<i64: 2, 2>, scalar_prefetch = 0 : i64, scratch_operands = 3 : i64, tpu.core_type = #tpu.core_type<tc>, window_params = [{transform_indices = @transform_0, window_bounds = array<i64: 1, 64, 128>}, {transform_indices = @transform_1, window_bounds = array<i64: 1, 64, 128>}, {transform_indices = @transform_2, window_bounds = array<i64: 1, 32, 128>}, {pipeline_mode = #tpu.pipeline_mode<synchronous>, transform_indices = @transform_3, window_bounds = array<i64: 128, 128>}, {pipeline_mode = #tpu.pipeline_mode<synchronous>, transform_indices = @transform_4, window_bounds = array<i64: 1, 128>}, {pipeline_mode = #tpu.pipeline_mode<synchronous>, transform_indices = @transform_5, window_bounds = array<i64: 128, 128>}, {pipeline_mode = #tpu.pipeline_mode<synchronous>, transform_indices = @transform_6, window_bounds = array<i64: 1, 128>}, {pipeline_mode = #tpu.pipeline_mode<synchronous>, transform_indices = @transform_7, window_bounds = array<i64: 128, 128>}, {pipeline_mode = #tpu.pipeline_mode<synchronous>, transform_indices = @transform_8, window_bounds = array<i64: 1, 128>}, {pipeline_mode = #tpu.pipeline_mode<synchronous>, transform_indices = @transform_9, window_bounds = array<i64: 128, 128>}, {pipeline_mode = #tpu.pipeline_mode<synchronous>, transform_indices = @transform_10, window_bounds = array<i64: 1, 128>}, {transform_indices = @transform_11, window_bounds = array<i64: 1, 32, 128>}]} {
    %c0_i32 = arith.constant 0 : i32
    %0 = arith.cmpi eq, %arg1, %c0_i32 : i32
    %1 = arith.extui %0 : i1 to i32
    %c0_i32_0 = arith.constant 0 : i32
    %2 = arith.cmpi ne, %1, %c0_i32_0 : i32
    scf.if %2 {
      %c0_57 = arith.constant 0 : index
      %c0_58 = arith.constant 0 : index
      %c0_59 = arith.constant 0 : index
      %107 = vector.load %arg3[%c0_57, %c0_58, %c0_59] : memref<1x64x128xbf16, #tpu.memory_space<vmem>>, vector<1x64x128xbf16>
      %108 = vector.shape_cast %107 : vector<1x64x128xbf16> to vector<64x128xbf16>
      %c0_60 = arith.constant 0 : index
      %c0_61 = arith.constant 0 : index
      %109 = vector.load %arg7[%c0_60, %c0_61] : memref<128x128xbf16, #tpu.memory_space<vmem>>, vector<128x128xbf16>
      %cst_62 = arith.constant dense<0.000000e+00> : vector<64x128xf32>
      %110 = tpu.matmul %108, %109, %cst_62 {dimension_numbers = #tpu.dot_dimension_numbers<[1], [0], [0], [1], [0, 0, 1, 1], [], []>} : vector<64x128xbf16>, vector<128x128xbf16>, vector<64x128xf32> -> vector<64x128xf32>
      %c0_63 = arith.constant 0 : index
      %c0_64 = arith.constant 0 : index
      %111 = vector.load %arg8[%c0_63, %c0_64] : memref<1x128xf32, #tpu.memory_space<vmem>>, vector<1x128xf32>
      %112 = vector.broadcast %111 : vector<1x128xf32> to vector<64x128xf32>
      %113 = arith.addf %110, %112 : vector<64x128xf32>
      %c0_65 = arith.constant 0 : index
      %c0_66 = arith.constant 0 : index
      %c0_67 = arith.constant 0 : index
      %114 = vector.load %arg2[%c0_65, %c0_66, %c0_67] : memref<1x64x128xbf16, #tpu.memory_space<vmem>>, vector<1x64x128xbf16>
      %115 = vector.shape_cast %114 : vector<1x64x128xbf16> to vector<64x128xbf16>
      %c0_68 = arith.constant 0 : index
      %c0_69 = arith.constant 0 : index
      %116 = vector.load %arg5[%c0_68, %c0_69] : memref<128x128xbf16, #tpu.memory_space<vmem>>, vector<128x128xbf16>
      %cst_70 = arith.constant dense<0.000000e+00> : vector<64x128xf32>
      %117 = tpu.matmul %115, %116, %cst_70 {dimension_numbers = #tpu.dot_dimension_numbers<[1], [0], [0], [1], [0, 0, 1, 1], [], []>} : vector<64x128xbf16>, vector<128x128xbf16>, vector<64x128xf32> -> vector<64x128xf32>
      %c0_71 = arith.constant 0 : index
      %c0_72 = arith.constant 0 : index
      %118 = vector.load %arg6[%c0_71, %c0_72] : memref<1x128xf32, #tpu.memory_space<vmem>>, vector<1x128xf32>
      %119 = vector.broadcast %118 : vector<1x128xf32> to vector<64x128xf32>
      %120 = arith.addf %117, %119 : vector<64x128xf32>
      %121 = arith.truncf %113 : vector<64x128xf32> to vector<64x128xbf16>
      %c0_73 = arith.constant 0 : index
      %c0_74 = arith.constant 0 : index
      %122 = vector.load %arg14[%c0_73, %c0_74] : memref<64x128xbf16, #tpu.memory_space<vmem>>, vector<64x128xbf16>
      tpu.vector_store %arg14[%c0_73, %c0_74], %121 {strides = array<i32>} : memref<64x128xbf16, #tpu.memory_space<vmem>>, vector<64x128xbf16>,
      %123 = arith.truncf %120 : vector<64x128xf32> to vector<64x128xbf16>
      %c0_75 = arith.constant 0 : index
      %c0_76 = arith.constant 0 : index
      %124 = vector.load %arg15[%c0_75, %c0_76] : memref<64x128xbf16, #tpu.memory_space<vmem>>, vector<64x128xbf16>
      tpu.vector_store %arg15[%c0_75, %c0_76], %123 {strides = array<i32>} : memref<64x128xbf16, #tpu.memory_space<vmem>>, vector<64x128xbf16>,
    } else {
    }
    %c0 = arith.constant 0 : index
    %c0_1 = arith.constant 0 : index
    %c0_2 = arith.constant 0 : index
    %3 = vector.load %arg4[%c0, %c0_1, %c0_2] : memref<1x32x128xbf16, #tpu.memory_space<vmem>>, vector<1x32x128xbf16>
    %4 = vector.shape_cast %3 : vector<1x32x128xbf16> to vector<32x128xbf16>
    %c0_3 = arith.constant 0 : index
    %c0_4 = arith.constant 0 : index
    %5 = vector.load %arg9[%c0_3, %c0_4] : memref<128x128xbf16, #tpu.memory_space<vmem>>, vector<128x128xbf16>
    %cst = arith.constant dense<0.000000e+00> : vector<32x128xf32>
    %6 = tpu.matmul %4, %5, %cst {dimension_numbers = #tpu.dot_dimension_numbers<[1], [0], [0], [1], [0, 0, 1, 1], [], []>} : vector<32x128xbf16>, vector<128x128xbf16>, vector<32x128xf32> -> vector<32x128xf32>
    %c0_5 = arith.constant 0 : index
    %c0_6 = arith.constant 0 : index
    %7 = vector.load %arg10[%c0_5, %c0_6] : memref<1x128xf32, #tpu.memory_space<vmem>>, vector<1x128xf32>
    %8 = vector.broadcast %7 : vector<1x128xf32> to vector<32x128xf32>
    %9 = arith.addf %6, %8 : vector<32x128xf32>
    %cst_7 = arith.constant 0.176776692 : f32
    %10 = vector.broadcast %cst_7 : f32 to vector<32x128xf32>
    %11 = arith.mulf %9, %10 : vector<32x128xf32>
    %12 = arith.truncf %11 : vector<32x128xf32> to vector<32x128xbf16>
    %c32_i32 = arith.constant 32 : i32
    %13 = arith.muli %arg1, %c32_i32 : i32
    %14 = tpu.iota {dimensions = array<i32: 0>} : vector<32x64xi32>
    %15 = vector.broadcast %13 : i32 to vector<32x64xi32>
    %16 = arith.addi %15, %14 : vector<32x64xi32>
    %17 = tpu.iota {dimensions = array<i32: 1>} : vector<32x64xi32>
    %18 = arith.cmpi sle, %17, %16 : vector<32x64xi32>
    %cst_8 = arith.constant 0.000000e+00 : f32
    %cst_9 = arith.constant -1.000000e+30 : f32
    %19 = vector.broadcast %cst_8 : f32 to vector<32x64xf32>
    %20 = vector.broadcast %cst_9 : f32 to vector<32x64xf32>
    %21 = arith.select %18, %19, %20 : vector<32x64xi1>, vector<32x64xf32>
    %22 = vector.extract_strided_slice %12 {offsets = [0, 0], sizes = [32, 32], strides = [1, 1]} : vector<32x128xbf16> to vector<32x32xbf16>
    %c0_10 = arith.constant 0 : index
    %c0_11 = arith.constant 0 : index
    %23 = vector.load %arg14[%c0_10, %c0_11] : memref<64x128xbf16, #tpu.memory_space<vmem>>, vector<64x32xbf16>
    %c0_12 = arith.constant 0 : index
    %c0_13 = arith.constant 0 : index
    %24 = vector.load %arg15[%c0_12, %c0_13] : memref<64x128xbf16, #tpu.memory_space<vmem>>, vector<64x32xbf16>
    %cst_14 = arith.constant dense<0.000000e+00> : vector<32x64xf32>
    %25 = tpu.matmul %22, %23, %cst_14 {dimension_numbers = #tpu.dot_dimension_numbers<[1], [1], [0], [0], [0, 0, 1, 0], [], []>} : vector<32x32xbf16>, vector<64x32xbf16>, vector<32x64xf32> -> vector<32x64xf32>
    %26 = arith.addf %25, %21 : vector<32x64xf32>
    %cst_15 = arith.constant dense<0xFF800000> : vector<32xf32>
    %27 = vector.multi_reduction <maximumf>, %26, %cst_15 [1] : vector<32x64xf32> to vector<32xf32>
    %28 = vector.shape_cast %27 : vector<32xf32> to vector<32x1xf32>
    %29 = vector.broadcast %28 : vector<32x1xf32> to vector<32x64xf32>
    %30 = arith.subf %26, %29 : vector<32x64xf32>
    %31 = math.exp %30 : vector<32x64xf32>
    %cst_16 = arith.constant dense<0.000000e+00> : vector<32xf32>
    %32 = vector.multi_reduction <add>, %31, %cst_16 [1] : vector<32x64xf32> to vector<32xf32>
    %33 = vector.shape_cast %32 : vector<32xf32> to vector<32x1xf32>
    %34 = tpu.reciprocal %33 {approx = true} : vector<32x1xf32> -> vector<32x1xf32>
    %35 = vector.broadcast %34 : vector<32x1xf32> to vector<32x64xf32>
    %36 = arith.mulf %31, %35 : vector<32x64xf32>
    %37 = arith.truncf %36 : vector<32x64xf32> to vector<32x64xbf16>
    %cst_17 = arith.constant dense<0.000000e+00> : vector<32x32xf32>
    %38 = tpu.matmul %37, %24, %cst_17 {dimension_numbers = #tpu.dot_dimension_numbers<[1], [0], [0], [1], [0, 0, 1, 1], [], []>} : vector<32x64xbf16>, vector<64x32xbf16>, vector<32x32xf32> -> vector<32x32xf32>
    %39 = arith.truncf %38 : vector<32x32xf32> to vector<32x32xbf16>
    %c0_18 = arith.constant 0 : index
    %c0_19 = arith.constant 0 : index
    %40 = vector.load %arg16[%c0_18, %c0_19] : memref<32x128xbf16, #tpu.memory_space<vmem>>, vector<32x32xbf16>
    tpu.vector_store %arg16[%c0_18, %c0_19], %39 {strides = array<i32>} : memref<32x128xbf16, #tpu.memory_space<vmem>>, vector<32x32xbf16>,
    %41 = vector.extract_strided_slice %12 {offsets = [0, 32], sizes = [32, 32], strides = [1, 1]} : vector<32x128xbf16> to vector<32x32xbf16>
    %c0_20 = arith.constant 0 : index
    %c32 = arith.constant 32 : index
    %42 = vector.load %arg14[%c0_20, %c32] : memref<64x128xbf16, #tpu.memory_space<vmem>>, vector<64x32xbf16>
    %c0_21 = arith.constant 0 : index
    %c32_22 = arith.constant 32 : index
    %43 = vector.load %arg15[%c0_21, %c32_22] : memref<64x128xbf16, #tpu.memory_space<vmem>>, vector<64x32xbf16>
    %cst_23 = arith.constant dense<0.000000e+00> : vector<32x64xf32>
    %44 = tpu.matmul %41, %42, %cst_23 {dimension_numbers = #tpu.dot_dimension_numbers<[1], [1], [0], [0], [0, 0, 1, 0], [], []>} : vector<32x32xbf16>, vector<64x32xbf16>, vector<32x64xf32> -> vector<32x64xf32>
    %45 = arith.addf %44, %21 : vector<32x64xf32>
    %cst_24 = arith.constant dense<0xFF800000> : vector<32xf32>
    %46 = vector.multi_reduction <maximumf>, %45, %cst_24 [1] : vector<32x64xf32> to vector<32xf32>
    %47 = vector.shape_cast %46 : vector<32xf32> to vector<32x1xf32>
    %48 = vector.broadcast %47 : vector<32x1xf32> to vector<32x64xf32>
    %49 = arith.subf %45, %48 : vector<32x64xf32>
    %50 = math.exp %49 : vector<32x64xf32>
    %cst_25 = arith.constant dense<0.000000e+00> : vector<32xf32>
    %51 = vector.multi_reduction <add>, %50, %cst_25 [1] : vector<32x64xf32> to vector<32xf32>
    %52 = vector.shape_cast %51 : vector<32xf32> to vector<32x1xf32>
    %53 = tpu.reciprocal %52 {approx = true} : vector<32x1xf32> -> vector<32x1xf32>
    %54 = vector.broadcast %53 : vector<32x1xf32> to vector<32x64xf32>
    %55 = arith.mulf %50, %54 : vector<32x64xf32>
    %56 = arith.truncf %55 : vector<32x64xf32> to vector<32x64xbf16>
    %cst_26 = arith.constant dense<0.000000e+00> : vector<32x32xf32>
    %57 = tpu.matmul %56, %43, %cst_26 {dimension_numbers = #tpu.dot_dimension_numbers<[1], [0], [0], [1], [0, 0, 1, 1], [], []>} : vector<32x64xbf16>, vector<64x32xbf16>, vector<32x32xf32> -> vector<32x32xf32>
    %58 = arith.truncf %57 : vector<32x32xf32> to vector<32x32xbf16>
    %c0_27 = arith.constant 0 : index
    %c32_28 = arith.constant 32 : index
    %59 = vector.load %arg16[%c0_27, %c32_28] : memref<32x128xbf16, #tpu.memory_space<vmem>>, vector<32x32xbf16>
    tpu.vector_store %arg16[%c0_27, %c32_28], %58 {strides = array<i32>} : memref<32x128xbf16, #tpu.memory_space<vmem>>, vector<32x32xbf16>,
    %60 = vector.extract_strided_slice %12 {offsets = [0, 64], sizes = [32, 32], strides = [1, 1]} : vector<32x128xbf16> to vector<32x32xbf16>
    %c0_29 = arith.constant 0 : index
    %c64 = arith.constant 64 : index
    %61 = vector.load %arg14[%c0_29, %c64] : memref<64x128xbf16, #tpu.memory_space<vmem>>, vector<64x32xbf16>
    %c0_30 = arith.constant 0 : index
    %c64_31 = arith.constant 64 : index
    %62 = vector.load %arg15[%c0_30, %c64_31] : memref<64x128xbf16, #tpu.memory_space<vmem>>, vector<64x32xbf16>
    %cst_32 = arith.constant dense<0.000000e+00> : vector<32x64xf32>
    %63 = tpu.matmul %60, %61, %cst_32 {dimension_numbers = #tpu.dot_dimension_numbers<[1], [1], [0], [0], [0, 0, 1, 0], [], []>} : vector<32x32xbf16>, vector<64x32xbf16>, vector<32x64xf32> -> vector<32x64xf32>
    %64 = arith.addf %63, %21 : vector<32x64xf32>
    %cst_33 = arith.constant dense<0xFF800000> : vector<32xf32>
    %65 = vector.multi_reduction <maximumf>, %64, %cst_33 [1] : vector<32x64xf32> to vector<32xf32>
    %66 = vector.shape_cast %65 : vector<32xf32> to vector<32x1xf32>
    %67 = vector.broadcast %66 : vector<32x1xf32> to vector<32x64xf32>
    %68 = arith.subf %64, %67 : vector<32x64xf32>
    %69 = math.exp %68 : vector<32x64xf32>
    %cst_34 = arith.constant dense<0.000000e+00> : vector<32xf32>
    %70 = vector.multi_reduction <add>, %69, %cst_34 [1] : vector<32x64xf32> to vector<32xf32>
    %71 = vector.shape_cast %70 : vector<32xf32> to vector<32x1xf32>
    %72 = tpu.reciprocal %71 {approx = true} : vector<32x1xf32> -> vector<32x1xf32>
    %73 = vector.broadcast %72 : vector<32x1xf32> to vector<32x64xf32>
    %74 = arith.mulf %69, %73 : vector<32x64xf32>
    %75 = arith.truncf %74 : vector<32x64xf32> to vector<32x64xbf16>
    %cst_35 = arith.constant dense<0.000000e+00> : vector<32x32xf32>
    %76 = tpu.matmul %75, %62, %cst_35 {dimension_numbers = #tpu.dot_dimension_numbers<[1], [0], [0], [1], [0, 0, 1, 1], [], []>} : vector<32x64xbf16>, vector<64x32xbf16>, vector<32x32xf32> -> vector<32x32xf32>
    %77 = arith.truncf %76 : vector<32x32xf32> to vector<32x32xbf16>
    %c0_36 = arith.constant 0 : index
    %c64_37 = arith.constant 64 : index
    %78 = vector.load %arg16[%c0_36, %c64_37] : memref<32x128xbf16, #tpu.memory_space<vmem>>, vector<32x32xbf16>
    tpu.vector_store %arg16[%c0_36, %c64_37], %77 {strides = array<i32>} : memref<32x128xbf16, #tpu.memory_space<vmem>>, vector<32x32xbf16>,
    %79 = vector.extract_strided_slice %12 {offsets = [0, 96], sizes = [32, 32], strides = [1, 1]} : vector<32x128xbf16> to vector<32x32xbf16>
    %c0_38 = arith.constant 0 : index
    %c96 = arith.constant 96 : index
    %80 = vector.load %arg14[%c0_38, %c96] : memref<64x128xbf16, #tpu.memory_space<vmem>>, vector<64x32xbf16>
    %c0_39 = arith.constant 0 : index
    %c96_40 = arith.constant 96 : index
    %81 = vector.load %arg15[%c0_39, %c96_40] : memref<64x128xbf16, #tpu.memory_space<vmem>>, vector<64x32xbf16>
    %cst_41 = arith.constant dense<0.000000e+00> : vector<32x64xf32>
    %82 = tpu.matmul %79, %80, %cst_41 {dimension_numbers = #tpu.dot_dimension_numbers<[1], [1], [0], [0], [0, 0, 1, 0], [], []>} : vector<32x32xbf16>, vector<64x32xbf16>, vector<32x64xf32> -> vector<32x64xf32>
    %83 = arith.addf %82, %21 : vector<32x64xf32>
    %cst_42 = arith.constant dense<0xFF800000> : vector<32xf32>
    %84 = vector.multi_reduction <maximumf>, %83, %cst_42 [1] : vector<32x64xf32> to vector<32xf32>
    %85 = vector.shape_cast %84 : vector<32xf32> to vector<32x1xf32>
    %86 = vector.broadcast %85 : vector<32x1xf32> to vector<32x64xf32>
    %87 = arith.subf %83, %86 : vector<32x64xf32>
    %88 = math.exp %87 : vector<32x64xf32>
    %cst_43 = arith.constant dense<0.000000e+00> : vector<32xf32>
    %89 = vector.multi_reduction <add>, %88, %cst_43 [1] : vector<32x64xf32> to vector<32xf32>
    %90 = vector.shape_cast %89 : vector<32xf32> to vector<32x1xf32>
    %91 = tpu.reciprocal %90 {approx = true} : vector<32x1xf32> -> vector<32x1xf32>
    %92 = vector.broadcast %91 : vector<32x1xf32> to vector<32x64xf32>
    %93 = arith.mulf %88, %92 : vector<32x64xf32>
    %94 = arith.truncf %93 : vector<32x64xf32> to vector<32x64xbf16>
    %cst_44 = arith.constant dense<0.000000e+00> : vector<32x32xf32>
    %95 = tpu.matmul %94, %81, %cst_44 {dimension_numbers = #tpu.dot_dimension_numbers<[1], [0], [0], [1], [0, 0, 1, 1], [], []>} : vector<32x64xbf16>, vector<64x32xbf16>, vector<32x32xf32> -> vector<32x32xf32>
    %96 = arith.truncf %95 : vector<32x32xf32> to vector<32x32xbf16>
    %c0_45 = arith.constant 0 : index
    %c96_46 = arith.constant 96 : index
    %97 = vector.load %arg16[%c0_45, %c96_46] : memref<32x128xbf16, #tpu.memory_space<vmem>>, vector<32x32xbf16>
    tpu.vector_store %arg16[%c0_45, %c96_46], %96 {strides = array<i32>} : memref<32x128xbf16, #tpu.memory_space<vmem>>, vector<32x32xbf16>,
    %c0_47 = arith.constant 0 : index
    %c0_48 = arith.constant 0 : index
    %98 = vector.load %arg16[%c0_47, %c0_48] : memref<32x128xbf16, #tpu.memory_space<vmem>>, vector<32x128xbf16>
    %c0_49 = arith.constant 0 : index
    %c0_50 = arith.constant 0 : index
    %99 = vector.load %arg11[%c0_49, %c0_50] : memref<128x128xbf16, #tpu.memory_space<vmem>>, vector<128x128xbf16>
    %cst_51 = arith.constant dense<0.000000e+00> : vector<32x128xf32>
    %100 = tpu.matmul %98, %99, %cst_51 {dimension_numbers = #tpu.dot_dimension_numbers<[1], [0], [0], [1], [0, 0, 1, 1], [], []>} : vector<32x128xbf16>, vector<128x128xbf16>, vector<32x128xf32> -> vector<32x128xf32>
    %c0_52 = arith.constant 0 : index
    %c0_53 = arith.constant 0 : index
    %101 = vector.load %arg12[%c0_52, %c0_53] : memref<1x128xf32, #tpu.memory_space<vmem>>, vector<1x128xf32>
    %102 = vector.broadcast %101 : vector<1x128xf32> to vector<32x128xf32>
    %103 = arith.addf %100, %102 : vector<32x128xf32>
    %c0_54 = arith.constant 0 : index
    %c0_55 = arith.constant 0 : index
    %c0_56 = arith.constant 0 : index
    %104 = vector.load %arg13[%c0_54, %c0_55, %c0_56] : memref<1x32x128xf32, #tpu.memory_space<vmem>>, vector<1x32x128xf32>
    %105 = vector.shape_cast %104 : vector<1x32x128xf32> to vector<32x128xf32>
    %106 = vector.shape_cast %103 : vector<32x128xf32> to vector<1x32x128xf32>
    tpu.vector_store %arg13[%c0_54, %c0_55, %c0_56], %106 {strides = array<i32>} : memref<1x32x128xf32, #tpu.memory_space<vmem>>, vector<1x32x128xf32>,
    return
  }
  func.func @transform_0(%arg0: i32, %arg1: i32) -> (i32, i32, i32) {
    %c0_i32 = arith.constant 0 : i32
    %c0_i32_0 = arith.constant 0 : i32
    %c0_i32_1 = arith.constant 0 : i32
    return %arg0, %c0_i32, %c0_i32_0 : i32, i32, i32
  }
  func.func @transform_1(%arg0: i32, %arg1: i32) -> (i32, i32, i32) {
    %c0_i32 = arith.constant 0 : i32
    %c0_i32_0 = arith.constant 0 : i32
    %c0_i32_1 = arith.constant 0 : i32
    return %arg0, %c0_i32, %c0_i32_0 : i32, i32, i32
  }
  func.func @transform_2(%arg0: i32, %arg1: i32) -> (i32, i32, i32) {
    %c0_i32 = arith.constant 0 : i32
    %c0_i32_0 = arith.constant 0 : i32
    return %arg0, %arg1, %c0_i32 : i32, i32, i32
  }
  func.func @transform_3(%arg0: i32, %arg1: i32) -> (i32, i32) {
    %c0_i32 = arith.constant 0 : i32
    %c0_i32_0 = arith.constant 0 : i32
    %c0_i32_1 = arith.constant 0 : i32
    return %c0_i32, %c0_i32_0 : i32, i32
  }
  func.func @transform_4(%arg0: i32, %arg1: i32) -> (i32, i32) {
    %c0_i32 = arith.constant 0 : i32
    %c0_i32_0 = arith.constant 0 : i32
    %c0_i32_1 = arith.constant 0 : i32
    return %c0_i32, %c0_i32_0 : i32, i32
  }
  func.func @transform_5(%arg0: i32, %arg1: i32) -> (i32, i32) {
    %c0_i32 = arith.constant 0 : i32
    %c0_i32_0 = arith.constant 0 : i32
    %c0_i32_1 = arith.constant 0 : i32
    return %c0_i32, %c0_i32_0 : i32, i32
  }
  func.func @transform_6(%arg0: i32, %arg1: i32) -> (i32, i32) {
    %c0_i32 = arith.constant 0 : i32
    %c0_i32_0 = arith.constant 0 : i32
    %c0_i32_1 = arith.constant 0 : i32
    return %c0_i32, %c0_i32_0 : i32, i32
  }
  func.func @transform_7(%arg0: i32, %arg1: i32) -> (i32, i32) {
    %c0_i32 = arith.constant 0 : i32
    %c0_i32_0 = arith.constant 0 : i32
    %c0_i32_1 = arith.constant 0 : i32
    return %c0_i32, %c0_i32_0 : i32, i32
  }
  func.func @transform_8(%arg0: i32, %arg1: i32) -> (i32, i32) {
    %c0_i32 = arith.constant 0 : i32
    %c0_i32_0 = arith.constant 0 : i32
    %c0_i32_1 = arith.constant 0 : i32
    return %c0_i32, %c0_i32_0 : i32, i32
  }
  func.func @transform_9(%arg0: i32, %arg1: i32) -> (i32, i32) {
    %c0_i32 = arith.constant 0 : i32
    %c0_i32_0 = arith.constant 0 : i32
    %c0_i32_1 = arith.constant 0 : i32
    return %c0_i32, %c0_i32_0 : i32, i32
  }
  func.func @transform_10(%arg0: i32, %arg1: i32) -> (i32, i32) {
    %c0_i32 = arith.constant 0 : i32
    %c0_i32_0 = arith.constant 0 : i32
    %c0_i32_1 = arith.constant 0 : i32
    return %c0_i32, %c0_i32_0 : i32, i32
  }
  func.func @transform_11(%arg0: i32, %arg1: i32) -> (i32, i32, i32) {
    %c0_i32 = arith.constant 0 : i32
    %c0_i32_0 = arith.constant 0 : i32
    return %arg0, %arg1, %c0_i32 : i32, i32, i32
  }
}

</mosaic_0001>

<bundles_post_ra>
// kernel: tpu_custom_call.1
= control target key start
LH: loop header
LB: loop body
LE: loop exit
PB: predicated region body
PF: predicated region fallthrough
CT: control target
= control target key end

     0   :  { %s4059_s0 = inlined_call_operand.hbm [shape: bf16[2,64,128], index: 0, kind: input, shape index: {}]   ;;  %s4060_s1 = inlined_call_operand.hbm [shape: bf16[2,64,128], index: 1, kind: input, shape index: {}]   ;;  %s4061_s2 = inlined_call_operand.hbm [shape: bf16[2,64,128], index: 2, kind: input, shape index: {}]   ;;  %s4062_s3 = inlined_call_operand.hbm [shape: bf16[128,128], index: 3, kind: input, shape index: {}]   ;;  %s4063_s4 = inlined_call_operand.vmem [shape: f32[1,128], index: 4, kind: input, shape index: {}]   ;;  %s4064_s5 = inlined_call_operand.hbm [shape: bf16[128,128], index: 5, kind: input, shape index: {}]   ;;  %s4065_s6 = inlined_call_operand.vmem [shape: f32[1,128], index: 6, kind: input, shape index: {}]   ;;  %s4066_s7 = inlined_call_operand.hbm [shape: bf16[128,128], index: 7, kind: input, shape index: {}]   ;;  %s4067_s8 = inlined_call_operand.vmem [shape: f32[1,128], index: 8, kind: input, shape index: {}]   ;;  %s4068_s9 = inlined_call_operand.hbm [shape: bf16[128,128], index: 9, kind: input, shape index: {}]   ;;  %s4069_s10 = inlined_call_operand.vmem [shape: f32[1,128], index: 10, kind: input, shape index: {}]   ;;  %s4070_s11 = inlined_call_operand.hbm [shape: f32[2,64,128], index: 11, kind: output, shape index: {}]  }
   0x1   :  { %4098 = sst [smem:[#allocation32_spill]] %s4059_s0 }
   0x2   :  { %4099 = sst [smem:[#allocation33_spill]] %s4060_s1 }
   0x3   :  { %4100 = sst [smem:[#allocation34_spill]] %s4062_s3 }
   0x4   :  { %4101 = sst [smem:[#allocation35_spill]] %s4063_s4 }
   0x5   :  { %4102 = sst [smem:[#allocation36_spill]] %s4064_s5 }
   0x6   :  { %4103 = sst [smem:[#allocation37_spill]] %s4065_s6 }
   0x7   :  { %4104 = sst [smem:[#allocation38_spill]] %s4066_s7 }
   0x8   :  { %4105 = sst [smem:[#allocation39_spill]] %s4067_s8 }
   0x9   :  { %4106 = sst [smem:[#allocation40_spill]] %s4069_s10 }
   0xa   :  { %4107 = sst [smem:[#allocation41_spill]] %s4070_s11 }
   0xb   :  { %16 = vsyncpa [#allocation6], 0 }
   0xc   :  { %18 = vsyncpa [#allocation6 + $0x1], 0 }
   0xd   :  { %19 = vsyncpa [#allocation9], 0 }
   0xe   :  { %21 = vsyncpa [#allocation9 + $0x1], 0 }
   0xf   :  { %22 = vsyncpa [#allocation12], 0 }
  0x10   :  { %23 = vsyncpa [#allocation15], 0 }
  0x11   :  { %24 = vsyncpa [#allocation7], 0 }
  0x12   :  { %26 = vsyncpa [#allocation7 + $0x1], 0  ;;  %s3316_s17 = smov 0   ;;  %s3318_s18 = smov 0  }
  0x13   :  { %s3320_s19 = smov 0   ;;  %s3322_s20 = smov 0  }
  0x14   :  { %s3324_s21 = smov 0   ;;  %s3326_s22 = smov 0  }
  0x15   :  { %s3328_s23 = smov 0   ;;  %s3330_s24 = smov 0  }
  0x16   :  { %s3332_s25 = smov 0   ;;  %s3334_s26 = smov 0  }
  0x17   :  { %s3336_s27 = smov 0  }
  0x18 LB: > { %4108 = sst [smem:[#allocation24_spill]] %s3198_s17  ;;  %s3372_s28 = sadd.s32 4294967295, %s3238_s27   ;;  %s3238_s27 = sphi %s3336_s27, %s32_s27   ;;  %s3234_s26 = sphi %s3334_s26, %s4178_s26   ;;  %s3230_s25 = sphi %s3332_s25, %s4177_s25   ;;  %s3226_s24 = sphi %s3330_s24, %s4176_s24   ;;  %s3222_s23 = sphi %s3328_s23, %s4175_s23   ;;  %s3218_s22 = sphi %s3326_s22, %s4174_s22   ;;  %s3214_s21 = sphi %s3324_s21, %s4173_s21   ;;  %s3210_s20 = sphi %s3322_s20, %s4167_s20   ;;  %s3206_s19 = sphi %s3320_s19, %s4172_s19   ;;  %s3202_s18 = sphi %s3318_s18, %s4171_s18   ;;  %s3198_s17 = sphi %s3316_s17, %s4170_s17  }
  0x19   : > { %4109 = sst [smem:[#allocation25_spill]] %s3214_s21  ;;  %s2241_s29 = sadd.s32 4294967294, %s3238_s27  }
  0x1a   : > { %4110 = sst [smem:[#allocation26_spill]] %s3222_s23  ;;  %p4074_p0 = scmp.eq.s32.totalorder %s3372_s28, 0 }
  0x1b   : > { %4111 = sst [smem:[#allocation27_spill]] %s3226_s24  ;;  %p118_p1 = scmp.ne.s32.totalorder %s3202_s18, %s3198_s17 }
  0x1c   : > { %p318_p3 = scmp.eq.s32.totalorder %s2241_s29, 3  ;;  %p2242_p5 = scmp.ge.s32.totalorder %s3238_s27, 1 }
  0x1d   : > { %p3381_p4 = por %p118_p1, %p4074_p0  ;;  %p325_p7 = scmp.lt.s32.totalorder %s3238_s27, 5 }
  0x1e   : > { %p3386_p6 = por %p318_p3, %p118_p1  ;;  %s3240_s14 = smov [#allocation11]  }
  0x1f   : > { %s4112_s30 = scalar_select %p3381_p4, 1, 0 }
  0x20   : > { %s4114_s12 = scalar_select %p3386_p6, 1, 0 }
  0x21   : > { %4113 = sst [smem:[#allocation28_spill]] %s4112_s30  ;;  %p3391_p8 = pnand %p2242_p5, %p325_p7 }
  0x22   : > { %4115 = sst [smem:[#allocation29_spill]] %s4114_s12  ;;  %s337_s15 = sshll.u32 %s3240_s14, 4  ;;  %s338_s15 = int_to_ptr.vmem [resolvable:$true] %s337_s15 }
  0x23   : > { %s4116_s13 = scalar_select %p3391_p8, 1, 0 }
  0x24   : > { %p2655_p9 = pneg %p3391_p8  ;;  %s3241_s29 = smov [#allocation14]  }
  0x25   : > { %4117 = sst [smem:[#allocation30_spill]] %s4116_s13  ;;  %s369_s17 = sshll.u32 %s3241_s29, 4  ;;  %s3403_s17 = int_to_ptr.vmem [resolvable:$true] %s369_s17 }
  0x26   : > { %p3399_p10 = pnand %p2655_p9, %p4074_p0  ;;  %s4119_s3 = sld [smem:[#allocation34_spill]] }
  0x28   : > { %s4118_s16 = scalar_select %p3399_p10, 1, 0 }
  0x29   : > { %p3413_p12 = pneg %p3399_p10 }
  0x2c   : > { %s2898_s10 = scalar_lea.hbm %s4119_s3, 1024 }
  0x2d   : > { %p2899_p11 = scmp.ne.s32.totalorder %s4119_s3, %s2898_s10  ;;  %p2905_p3 = scmp.lt.u32.totalorder %s2898_s10, %s4119_s3 }
  0x2f   : > { %p2901_p13 = pnand %p3413_p12, %p2899_p11 }
  0x31   : > { %p2902_p1 = pneg %p2901_p13 }
  0x33   : > { %p2907_p5 = pnand %p2905_p3, %p2902_p1 }
  0x35   : > { %2910 = shalt.err (!%p2907_p5)
}
  0x36   : > { %s2911_s11 = scalar_lea.vmem %s338_s15, 1024  ;;  %p2919_p0 = scmp.lt.s32.totalorder %s338_s15, %s338_s15 }
  0x37   : > { %p2912_p7 = scmp.ne.s32.totalorder %s338_s15, %s2911_s11  ;;  %p2920_p6 = scmp.lt.s32.totalorder %s2911_s11, %s2911_s11 }
  0x39   : > { %p2914_p9 = pnand %p2912_p7, %p3413_p12  ;;  %p2921_p4 = por %p2920_p6, %p2919_p0 }
  0x3b   : > { %p2915_p2 = pneg %p2914_p9 }
  0x3d   : > { %p2922_p8 = pnand %p2921_p4, %p2915_p2 }
  0x3f   : > { %2925 = shalt.err (!%p2922_p8)
}
  0x40   : > { %s4083_s8 = smov 64   ;;  %s4085_s24 = smov 4  }
  0x41   : > { %2658 = dma.hbm_to_vmem [thread:$0]  (!%p3399_p10), %s4119_s3, 1024, %s338_s15, [#allocation12], %s4083_s8, %s4083_s8, %s4085_s24  }
  0x42   : > { %s4121_s7 = sld [smem:[#allocation38_spill]] }
  0x48   : > { %s2926_s6 = scalar_lea.hbm %s4121_s7, 1024 }
  0x49   : > { %p2927_p0 = scmp.ne.s32.totalorder %s4121_s7, %s2926_s6  ;;  %p2933_p6 = scmp.lt.u32.totalorder %s2926_s6, %s4121_s7 }
  0x4b   : > { %p2929_p2 = pnand %p2927_p0, %p3413_p12 }
  0x4d   : > { %p2930_p4 = pneg %p2929_p2 }
  0x4f   : > { %p2935_p8 = pnand %p2933_p6, %p2930_p4 }
  0x51   : > { %2938 = shalt.err (!%p2935_p8)
}
  0x52   : > { %s2939_s15 = scalar_lea.vmem %s3403_s17, 1024  ;;  %p2947_p3 = scmp.lt.s32.totalorder %s3403_s17, %s3403_s17 }
  0x53   : > { %p2940_p11 = scmp.ne.s32.totalorder %s3403_s17, %s2939_s15  ;;  %p2948_p5 = scmp.lt.s32.totalorder %s2939_s15, %s2939_s15 }
  0x55   : > { %p2942_p13 = pnand %p2940_p11, %p3413_p12  ;;  %p2949_p7 = por %p2948_p5, %p2947_p3 }
  0x57   : > { %p2943_p1 = pneg %p2942_p13 }
  0x59   : > { %p2950_p9 = pnand %p2949_p7, %p2943_p1 }
  0x5b   : > { %2953 = shalt.err (!%p2950_p9)
}
  0x5c   : > { %2664 = dma.hbm_to_vmem [thread:$0]  (!%p3399_p10), %s4121_s7, 1024, %s3403_s17, [#allocation15], %s4083_s8, %s4083_s8, %s4085_s24  }
  0x5d   : > { %p58_p0 = scmp.ne.s32.totalorder %s3218_s22, %s3214_s21  ;;  %p4088_p2 = scmp.eq.s32.totalorder %s3238_s27, 0 }
  0x5e   : > { %p64_p4 = scmp.ne.s32.totalorder %s3214_s21, %s3210_s20  ;;  %p4087_p6 = scmp.lt.s32.totalorder %s3238_s27, 4 }
  0x5f   : > { %p60_p8 = por %p4088_p2, %p58_p0  ;;  %s4081_s4 = sand.u32 1, %s3218_s22  }
  0x60   : > { %p4122_p11 = scmp.eq.s32.totalorder %s3372_s28, 0  ;;  %s3477_s12 = sshll.u32 %s4081_s4, 5 }
  0x61   : > { %s4082_s29 = sshll.u32 %s3234_s26, 9  ;;  %p3482_p1 = pnand %p4087_p6, %p60_p8 }
  0x62   : > { %p3471_p13 = por %p4122_p11, %p64_p4  ;;  %s423_s20 = sand.u32 1, %s3238_s27  }
  0x63   : > { %s4125_s17 = scalar_select %p3482_p1, 1, 0 }
  0x64   : > { %s4123_s10 = scalar_select %p3471_p13, 1, 0 }
  0x65   : > { %s4126_s1 = sld [smem:[#allocation33_spill]]  ;;  %s427_s23 = scalar_lea.vmem [#allocation8], %s3477_s12 }
  0x66   : > { %4124 = sst [smem:[#allocation31_spill]] %s4123_s10  ;;  %s434_s13 = sshll.u32 %s427_s23, 4  ;;  %s3495_s13 = int_to_ptr.vmem [resolvable:$true] %s434_s13 }
  0x67   : > { %s3497_s30 = scalar_lea.sflag [#allocation9], %s423_s20  ;;  %p4095_p5 = pneg %p3482_p1 }
  0x6b   : > { %s3492_s6 = scalar_lea.hbm %s4126_s1, %s4082_s29  ;;  %s2959_s29 = scalar_lea.hbm %s4126_s1, 1024 }
  0x6c   : > { %s2954_s4 = scalar_lea.hbm %s3492_s6, 512  ;;  %p2960_p0 = scmp.lt.u32.totalorder %s3492_s6, %s4126_s1 }
  0x6d   : > { %p2955_p3 = scmp.ne.s32.totalorder %s3492_s6, %s2954_s4  ;;  %p2961_p4 = scmp.lt.u32.totalorder %s2959_s29, %s2954_s4 }
  0x6e   : > { %p2963_p11 = scmp.lt.u32.totalorder %s2954_s4, %s3492_s6 }
  0x6f   : > { %p2957_p7 = pnand %p4095_p5, %p2955_p3  ;;  %p2962_p8 = por %p2961_p4, %p2960_p0 }
  0x71   : > { %p2958_p9 = pneg %p2957_p7  ;;  %p2964_p6 = por %p2963_p11, %p2962_p8 }
  0x73   : > { %p2965_p2 = pnand %p2964_p6, %p2958_p9 }
  0x75   : > { %2968 = shalt.err (!%p2965_p2)
}
  0x76   : > { %s2969_s20 = scalar_lea.vmem %s3495_s13, 512  ;;  %s3244_s23 = smov [#allocation8]  }
  0x77   : > { %p2970_p3 = scmp.ne.s32.totalorder %s3495_s13, %s2969_s20  ;;  %s2974_s11 = sshll.u32 %s3244_s23, 4  ;;  %s2975_s11 = int_to_ptr.vmem [resolvable:$false] %s2974_s11 }
  0x78   : > { %s2976_s8 = scalar_lea.vmem %s2975_s11, 1024  ;;  %p2977_p10 = scmp.lt.s32.totalorder %s3495_s13, %s2975_s11 }
  0x79   : > { %p2972_p7 = pnand %p2970_p3, %p4095_p5  ;;  %p2978_p0 = scmp.lt.s32.totalorder %s2976_s8, %s2969_s20 }
  0x7b   : > { %p2973_p13 = pneg %p2972_p7  ;;  %p2979_p4 = por %p2978_p0, %p2977_p10 }
  0x7d   : > { %p2980_p8 = pnand %p2979_p4, %p2973_p13 }
  0x7f   : > { %2983 = shalt.err (!%p2980_p8)
}
  0x80   : > { %s4127_s24 = smov 4   ;;  %s4128_s4 = smov 64  }
  0x81   : > { %2674 = dma.hbm_to_vmem [thread:$0]  (!%p3482_p1), %s3492_s6, 512, %s3495_s13, %s3497_s30, %s4128_s4, %s4128_s4, %s4127_s24  }
  0x82   : > { %s3245_s29 = smov [#allocation13]   ;;  %s3246_s23 = smov [#allocation16]  }
  0x83   : > { %s353_s15 = sshll.u32 %s3245_s29, 4  ;;  %s385_s1 = sshll.u32 %s3246_s23, 4  ;;  %s354_s15 = int_to_ptr.vmem [resolvable:$true] %s353_s15  ;;  %s386_s1 = int_to_ptr.vmem [resolvable:$true] %s385_s1 }
  0x84   : > { %s4129_s5 = sld [smem:[#allocation36_spill]] }
  0x8a   : > { %s2984_s8 = scalar_lea.hbm %s4129_s5, 1024 }
  0x8b   : > { %p2985_p10 = scmp.ne.s32.totalorder %s4129_s5, %s2984_s8  ;;  %p2991_p13 = scmp.lt.u32.totalorder %s2984_s8, %s4129_s5 }
  0x8d   : > { %p2987_p2 = pnand %p2985_p10, %p3413_p12 }
  0x8f   : > { %p2988_p6 = pneg %p2987_p2 }
  0x91   : > { %p2993_p9 = pnand %p2991_p13, %p2988_p6 }
  0x93   : > { %2996 = shalt.err (!%p2993_p9)
}
  0x94   : > { %s2997_s13 = scalar_lea.vmem %s354_s15, 1024  ;;  %p3005_p0 = scmp.lt.s32.totalorder %s354_s15, %s354_s15 }
  0x95   : > { %p2998_p11 = scmp.ne.s32.totalorder %s354_s15, %s2997_s13  ;;  %p3006_p4 = scmp.lt.s32.totalorder %s2997_s13, %s2997_s13 }
  0x97   : > { %p3000_p3 = pnand %p2998_p11, %p3413_p12  ;;  %p3007_p8 = por %p3006_p4, %p3005_p0 }
  0x99   : > { %p3001_p7 = pneg %p3000_p3 }
  0x9b   : > { %p3008_p5 = pnand %p3007_p8, %p3001_p7 }
  0x9d   : > { %3011 = shalt.err (!%p3008_p5)
}
  0x9e   : > { %p4130_p10 = scmp.ne.s32.totalorder %s4118_s16, 0  ;;  %s3012_s6 = scalar_lea.hbm %s4068_s9, 1024 }
  0x9f   : > { %p3013_p2 = scmp.ne.s32.totalorder %s4068_s9, %s3012_s6  ;;  %p3019_p13 = scmp.lt.u32.totalorder %s3012_s6, %s4068_s9 }
  0xa0   : > { %2661 = dma.hbm_to_vmem [thread:$0]  (!%p4130_p10), %s4129_s5, 1024, %s354_s15, [#allocation12], %s4128_s4, %s4128_s4, %s4127_s24  }
  0xa1   : > { %p3015_p5 = pnand %p3013_p2, %p3413_p12 }
  0xa3   : > { %p3016_p6 = pneg %p3015_p5 }
  0xa5   : > { %p3021_p9 = pnand %p3019_p13, %p3016_p6 }
  0xa7   : > { %3024 = shalt.err (!%p3021_p9)
}
  0xa8   : > { %s3025_s8 = scalar_lea.vmem %s386_s1, 1024  ;;  %p3033_p0 = scmp.lt.s32.totalorder %s386_s1, %s386_s1 }
  0xa9   : > { %p3026_p11 = scmp.ne.s32.totalorder %s386_s1, %s3025_s8  ;;  %p3034_p4 = scmp.lt.s32.totalorder %s3025_s8, %s3025_s8 }
  0xab   : > { %p3028_p3 = pnand %p3026_p11, %p3413_p12  ;;  %p3035_p8 = por %p3034_p4, %p3033_p0 }
  0xad   : > { %p3029_p7 = pneg %p3028_p3 }
  0xaf   : > { %p3036_p1 = pnand %p3035_p8, %p3029_p7 }
  0xb1   : > { %3039 = shalt.err (!%p3036_p1)
}
  0xb2   : > { %2667 = dma.hbm_to_vmem [thread:$0]  (!%p4130_p10), %s4068_s9, 1024, %s386_s1, [#allocation15], %s4128_s4, %s4128_s4, %s4127_s24  }
  0xb3   : > { %s4131_s14 = sshll.u32 %s3234_s26, 9  ;;  %s4132_s0 = sld [smem:[#allocation32_spill]] }
  0xb4   : > { %s406_s16 = scalar_lea.vmem [#allocation5], %s3477_s12  ;;  %s4133_s6 = sand.u32 1, %s3218_s22  }
  0xb5   : > { %s413_s10 = sshll.u32 %s406_s16, 4  ;;  %s3582_s29 = scalar_lea.sflag [#allocation6], %s4133_s6  ;;  %s3578_s10 = int_to_ptr.vmem [resolvable:$true] %s413_s10 }
  0xb6   : > { %p4134_p1 = scmp.ne.s32.totalorder %s4125_s17, 0 }
  0xb8   : > { %p4135_p10 = pneg %p4134_p1 }
  0xb9   : > { %s3575_s21 = scalar_lea.hbm %s4132_s0, %s4131_s14  ;;  %s3045_s20 = scalar_lea.hbm %s4132_s0, 1024 }
  0xba   : > { %s3040_s23 = scalar_lea.hbm %s3575_s21, 512  ;;  %p3046_p6 = scmp.lt.u32.totalorder %s3575_s21, %s4132_s0 }
  0xbb   : > { %p3041_p12 = scmp.ne.s32.totalorder %s3575_s21, %s3040_s23  ;;  %p3047_p13 = scmp.lt.u32.totalorder %s3045_s20, %s3040_s23 }
  0xbc   : > { %p3049_p11 = scmp.lt.u32.totalorder %s3040_s23, %s3575_s21 }
  0xbd   : > { %p3043_p2 = pnand %p3041_p12, %p4135_p10  ;;  %p3048_p9 = por %p3047_p13, %p3046_p6 }
  0xbf   : > { %p3044_p5 = pneg %p3043_p2  ;;  %p3050_p3 = por %p3049_p11, %p3048_p9 }
  0xc1   : > { %p3051_p7 = pnand %p3050_p3, %p3044_p5 }
  0xc3   : > { %3054 = shalt.err (!%p3051_p7)
}
  0xc4   : > { %s3055_s12 = scalar_lea.vmem %s3578_s10, 512  ;;  %p4136_p4 = pmov %p4135_p10 }
  0xc5   : > { %p3056_p0 = scmp.ne.s32.totalorder %s3578_s10, %s3055_s12  ;;  %s3247_s13 = smov [#allocation5]  }
  0xc6   : > { %s3060_s14 = sshll.u32 %s3247_s13, 4  ;;  %s3061_s14 = int_to_ptr.vmem [resolvable:$false] %s3060_s14 }
  0xc7   : > { %p3058_p8 = pnand %p3056_p0, %p4136_p4  ;;  %s3062_s3 = scalar_lea.vmem %s3061_s14, 1024 }
  0xc8   : > { %p3063_p10 = scmp.lt.s32.totalorder %s3578_s10, %s3061_s14  ;;  %p3064_p2 = scmp.lt.s32.totalorder %s3062_s3, %s3055_s12 }
  0xc9   : > { %p3059_p12 = pneg %p3058_p8 }
  0xca   : > { %p3065_p6 = por %p3064_p2, %p3063_p10 }
  0xcc   : > { %p3066_p13 = pnand %p3065_p6, %p3059_p12 }
  0xce   : > { %3069 = shalt.err (!%p3066_p13)
}
  0xcf   : > { %2671 = dma.hbm_to_vmem [thread:$0]  (!%p4134_p1), %s3575_s21, 512, %s3578_s10, %s3582_s29, %s4128_s4, %s4128_s4, %s4127_s24  }
  0xd0   : > { %s41_s17 = sadd.s32 1, %s3230_s25  ;;  %s105_s7 = sadd.s32 1, %s3206_s19 }
  0xd1   : > { %p42_p5 = scmp.ge.s32.totalorder %s41_s17, 2  ;;  %p112_p9 = scmp.ne.s32.totalorder %s3206_s19, %s3202_s18 }
  0xd2   : > { %s446_s16 = sand.u32 1, %s3206_s19   ;;  %s2255_s6 = sshll.u32 %s3230_s25, 2 }
  0xd3   : > { %s4180_s17 = smov (%p42_p5, %s41_s17), 0  ;;  %s4137_s23 = sadd.s32 1, %s3234_s26 }
  0xd4   : > { %s4182_s23 = smov (!%p42_p5, %s4137_s23), %s3234_s26  ;;  %s101_s1 = ssub.s32 %s3230_s25, %s4180_s17 }
  0xd5   : > { %p4138_p11 = scmp.eq.s32.totalorder %s3238_s27, 0  ;;  %p46_p1 = scmp.ge.s32.totalorder %s4182_s23, 2 }
  0xd6   : > { %p4140_p7 = scmp.eq.s32.totalorder %s3372_s28, 3  ;;  %s2254_s10 = sshll.u32 %s446_s16, 4 }
  0xd7   : > { %p3626_p3 = por %p112_p9, %p4138_p11  ;;  %s2256_s29 = sshll.u32 %s3234_s26, 3 }
  0xd8   : > { %p3632_p0 = por %p4140_p7, %p112_p9  ;;  %s4184_s23 = smov (%p46_p1, %s4182_s23), 0 }
  0xd9   : > { %s454_s20 = sadd.s32 %s2256_s29, %s2255_s6  ;;  %s48_s8 = ssub.s32 %s3234_s26, %s4184_s23 }
  0xda   : > { %s2257_s15 = sshll.u32 %s454_s20, 6  ;;  %p49_p4 = scmp.eq.s32.totalorder %s48_s8, 0 }
  0xdb   : > { %s102_s12 = sor.u32 %s101_s1, %s48_s8  ;;  %s3644_s3 = scalar_lea.hbm %s4061_s2, %s2257_s15 }
  0xdc   : > { %p103_p8 = scmp.eq.s32.totalorder %s102_s12, 0  ;;  %s4142_s0 = sadd.s32 1, %s3218_s22 }
  0xdd   : > { %s3649_s16 = scalar_select %p49_p4, %s3218_s22, %s4142_s0  }
  0xde   : > { %s3652_s5 = scalar_select %p103_p8, %s3206_s19, %s105_s7  }
  0xdf   : > { %s448_s6 = scalar_lea.vmem [#allocation10], %s2254_s10  ;;  %p4143_p12 = scmp.lt.s32.totalorder %s3238_s27, 4 }
  0xe0   : > { %s457_s29 = sshll.u32 %s448_s6, 4  ;;  %s3070_s20 = scalar_lea.hbm %s3644_s3, 256  ;;  %s3662_s29 = int_to_ptr.vmem [resolvable:$true] %s457_s29 }
  0xe1   : > { %p3658_p10 = pnand %p4143_p12, %p3626_p3  ;;  %p3071_p2 = scmp.ne.s32.totalorder %s3644_s3, %s3070_s20 }
  0xe2   : > { %s3075_s11 = scalar_lea.hbm %s4061_s2, 1024  ;;  %p3076_p9 = scmp.lt.u32.totalorder %s3644_s3, %s4061_s2 }
  0xe3   : > { %p3072_p6 = pneg %p3658_p10  ;;  %p3077_p11 = scmp.lt.u32.totalorder %s3075_s11, %s3070_s20 }
  0xe4   : > { %p3079_p1 = scmp.lt.u32.totalorder %s3070_s20, %s3644_s3 }
  0xe5   : > { %p3073_p13 = pnand %p3072_p6, %p3071_p2  ;;  %p3078_p3 = por %p3077_p11, %p3076_p9 }
  0xe7   : > { %p3074_p5 = pneg %p3073_p13  ;;  %p3080_p7 = por %p3079_p1, %p3078_p3 }
  0xe9   : > { %p3081_p4 = pnand %p3080_p7, %p3074_p5 }
  0xeb   : > { %3084 = shalt.err (!%p3081_p4)
}
  0xec   : > { %s3085_s15 = scalar_lea.vmem %s3662_s29, 256  ;;  %s3248_s12 = smov [#allocation10]  }
  0xed   : > { %p3086_p8 = scmp.ne.s32.totalorder %s3662_s29, %s3085_s15  ;;  %s3090_s13 = sshll.u32 %s3248_s12, 4  ;;  %s3091_s13 = int_to_ptr.vmem [resolvable:$false] %s3090_s13 }
  0xee   : > { %s3092_s14 = scalar_lea.vmem %s3091_s13, 512  ;;  %p3093_p13 = scmp.lt.s32.totalorder %s3662_s29, %s3091_s13 }
  0xef   : > { %p3088_p12 = pnand %p3086_p8, %p3072_p6  ;;  %p3094_p9 = scmp.lt.s32.totalorder %s3092_s14, %s3085_s15 }
  0xf1   : > { %p3089_p2 = pneg %p3088_p12  ;;  %p3095_p11 = por %p3094_p9, %p3093_p13 }
  0xf3   : > { %p3096_p3 = pnand %p3095_p11, %p3089_p2 }
  0xf5   : > { %3099 = shalt.err (!%p3096_p3)
}
  0xf6   : > { %2677 = dma.hbm_to_vmem [thread:$0]  (!%p3658_p10), %s3644_s3, 256, %s3662_s29, %s3497_s30, %s4128_s4, %s4128_s4, %s4127_s24  }
  0xf7   : > { %s4145_s6 = sld [smem:[#allocation30_spill]] }
  0xfd   : > { %p4146_p6 = scmp.ne.s32.totalorder %s4145_s6, 0 }
  0xfe   : > { %s4147_s20 = sld [smem:[#allocation25_spill]] (!%p4146_p6)  ;;  %s4148_s0 = sld [smem:[#allocation31_spill]] (!%p4146_p6) }
  0xff   : > { %469 = sbr.rel (%p4146_p6) target bundleno = 3646 (0xe3e), region = 64 }
 0x104   : > { %s471_s7 = sand.u32 (!%p4146_p6), 1, %s4147_s20   ;;  %p4149_p5 = scmp.ne.s32.totalorder (!%p4146_p6), %s4148_s0, 0 }
 0x105   : > { %s2259_s11 = sshll.u32 (!%p4146_p6), %s471_s7, 5  ;;  %s472_s10 = scalar_lea.sflag (!%p4146_p6), [#allocation6], %s471_s7 }
 0x106   : > { %s3696_s8 = scalar_lea.vmem [#allocation5], %s2259_s11 }
 0x107   : > { %3173 = dma.done.wait (%p4149_p5), %s472_s10, 512  }
 0x108   : > { %3175 = vsyncadd (%p4149_p5), %s472_s10, 4294966784  ;;  %s480_s1 = sand.u32 1, %s3372_s28   ;;  %s3703_s30 = scalar_lea.vmem [#allocation8], %s2259_s11 }
 0x109   : > { %s481_s15 = scalar_lea.sflag [#allocation9], %s480_s1 }
 0x10a   : > { %3177 = dma.done.wait (%p4149_p5), %s481_s15, 512  }
 0x10b   : > { %3179 = vsyncadd (%p4149_p5), %s481_s15, 4294966784  ;;  %s4150_s24 = sld [smem:[#allocation28_spill]]  ;;  %s3710_s4 = sand.u32 1, %s3202_s18  }
 0x10c   : > { %s2261_s3 = sshll.u32 %s3710_s4, 4 }
 0x10d   : > { %s3713_s29 = scalar_lea.vmem [#allocation10], %s2261_s3 }
 0x111   : > { %p4151_p10 = scmp.ne.s32.totalorder %s4150_s24, 0 }
 0x113   : > { %3181 = dma.done.wait (%p4151_p10), %s481_s15, 256  }
 0x114   : > { %3183 = vsyncadd (%p4151_p10), %s481_s15, 4294967040  ;;  %p4152_p1 = scmp.eq.s32.totalorder %s3372_s28, 0 }
 0x116   : > { %3185 = dma.done.wait (%p4152_p1), [#allocation12], 2048   ;;  %p4153_p7 = pmov %p4152_p1 }
 0x117   : > { %p4154_p4 = pmov %p4152_p1 }
 0x118   : > { %3187 = vsyncadd (%p4153_p7), [#allocation12], 4294965248 }
 0x119   : > { %3189 = dma.done.wait (%p4154_p4), [#allocation15], 2048   ;;  %p4155_p8 = pmov %p4152_p1 }
 0x11a   : > { %s2266_s12 = sshll.u32 %s3710_s4, 5  ;;  %s4156_s14 = sld [smem:[#allocation26_spill]] }
 0x11b   : > { %3191 = vsyncadd (%p4155_p8), [#allocation15], 4294965248  ;;  %s3728_s13 = scalar_lea.vmem [#allocation17], %s2266_s12 }
 0x120   : > { %p2267_p12 = scmp.ne.s32.totalorder %s4156_s14, 0 }
 0x121   : > { %v2792_v0 = vld [vmem:[#allocation13] sm:$0xff] (!%p2267_p12)   ;;  %v2794_v2 = vld [vmem:[#allocation13 + $0x8] sm:$0xff] (!%p2267_p12)   ;;  %v2796_v4 = vld [vmem:[#allocation13 + $0x10] sm:$0xff] (!%p2267_p12)   ;;  %s4157_s20 = sld [smem:[#allocation37_spill]] (!%p2267_p12)  ;;  %s4158_s11 = sld [smem:[#allocation35_spill]] (!%p2267_p12) }
 0x122   : > { %564 = sbr.rel (%p2267_p12) target bundleno = 551 (0x227), region = 96  ;;  %v2793_v1 = vld [vmem:[#allocation11] sm:$0xff] (!%p2267_p12)   ;;  %2431 = vmatprep.subr.bf16.mxu0 (!%p2267_p12), %v2792_v0  ;;  %v2795_v3 = vld [vmem:[#allocation11 + $0x8] sm:$0xff] (!%p2267_p12)   ;;  %v2797_v5 = vld [vmem:[#allocation11 + $0x10] sm:$0xff] (!%p2267_p12)  }
 0x123   : > { %2455 = vmatprep.subr.bf16.mxu1 (!%p2267_p12), %v2793_v1  ;;  %2432 = vmatpush3.bf16.msra.mxu0 (!%p2267_p12), %v2792_v0  ;;  %v2798_v6 = vld [vmem:[#allocation13 + $0x18] sm:$0xff] (!%p2267_p12)   ;;  %v2800_v8 = vld [vmem:[#allocation13 + $0x20] sm:$0xff] (!%p2267_p12)   ;;  %v2802_v10 = vld [vmem:[#allocation13 + $0x28] sm:$0xff] (!%p2267_p12)  }
 0x124   : > { %2456 = vmatpush3.bf16.msra.mxu1 (!%p2267_p12), %v2793_v1  ;;  %2433 = vmatprep.subr.bf16.mxu0 (!%p2267_p12), %v2794_v2  ;;  %v2799_v7 = vld [vmem:[#allocation11 + $0x18] sm:$0xff] (!%p2267_p12)   ;;  %v2801_v9 = vld [vmem:[#allocation11 + $0x20] sm:$0xff] (!%p2267_p12)   ;;  %v2803_v11 = vld [vmem:[#allocation11 + $0x28] sm:$0xff] (!%p2267_p12)  }
 0x125   : > { %2457 = vmatprep.subr.bf16.mxu1 (!%p2267_p12), %v2795_v3  ;;  %v2808_v12 = vld [vmem:[%s3703_s30] sm:$0xff] (!%p2267_p12)   ;;  %v2804_v14 = vld [vmem:[#allocation13 + $0x30] sm:$0xff] (!%p2267_p12)   ;;  %v2806_v16 = vld [vmem:[#allocation13 + $0x38] sm:$0xff] (!%p2267_p12)  }
 0x126   : > { %v2809_v13 = vld [vmem:[%s3696_s8] sm:$0xff] (!%p2267_p12)   ;;  %2447 = vmatprep.mubr.bf16.mxu0 (!%p2267_p12), %v2808_v12  ;;  %v2805_v15 = vld [vmem:[#allocation11 + $0x30] sm:$0xff] (!%p2267_p12)   ;;  %v2807_v17 = vld [vmem:[#allocation11 + $0x38] sm:$0xff] (!%p2267_p12)  }
 0x127   : > { %2434 = vmatpush3.bf16.msra.mxu0 (!%p2267_p12), %v2794_v2  ;;  %2471 = vmatprep.mubr.bf16.mxu1 (!%p2267_p12), %v2809_v13  ;;  %v2810_v18 = vld [vmem:[%s3703_s30 + $0x8] sm:$0xff] (!%p2267_p12)   ;;  %v2812_v20 = vld [vmem:[%s3703_s30 + $0x10] sm:$0xff] (!%p2267_p12)   ;;  %v2814_v22 = vld [vmem:[%s3703_s30 + $0x18] sm:$0xff] (!%p2267_p12)  }
 0x128   : > { %2458 = vmatpush3.bf16.msra.mxu1 (!%p2267_p12), %v2795_v3  ;;  %2435 = vmatprep.subr.bf16.mxu0 (!%p2267_p12), %v2796_v4  ;;  %v2811_v19 = vld [vmem:[%s3696_s8 + $0x8] sm:$0xff] (!%p2267_p12)   ;;  %v2813_v21 = vld [vmem:[%s3696_s8 + $0x10] sm:$0xff] (!%p2267_p12)   ;;  %v2815_v23 = vld [vmem:[%s3696_s8 + $0x18] sm:$0xff] (!%p2267_p12)  }
 0x129   : > { %2459 = vmatprep.subr.bf16.mxu1 %v2797_v5  ;;  %v2268_v25 = vld [vmem:[%s4157_s20] ss:$0 sm:$0xff] }
 0x12a   : > { %v2281_v27 = vld [vmem:[%s4158_s11] ss:$0 sm:$0xff] }
 0x12b   : > { %2436 = vmatpush3.bf16.msra.mxu0 %v2796_v4 }
 0x12c   : > { %2460 = vmatpush3.bf16.msra.mxu1 %v2797_v5  ;;  %2437 = vmatprep.subr.bf16.mxu0 %v2798_v6 }
 0x12d   : > { %2461 = vmatprep.subr.bf16.mxu1 %v2799_v7 }
 0x12f   : > { %2438 = vmatpush3.bf16.msra.mxu0 %v2798_v6 }
 0x130   : > { %2462 = vmatpush3.bf16.msra.mxu1 %v2799_v7  ;;  %2439 = vmatprep.subr.bf16.mxu0 %v2800_v8 }
 0x131   : > { %2463 = vmatprep.subr.bf16.mxu1 %v2801_v9 }
 0x133   : > { %2440 = vmatpush3.bf16.msra.mxu0 %v2800_v8 }
 0x134   : > { %2464 = vmatpush3.bf16.msra.mxu1 %v2801_v9  ;;  %2441 = vmatprep.subr.bf16.mxu0 %v2802_v10 }
 0x135   : > { %2465 = vmatprep.subr.bf16.mxu1 %v2803_v11 }
 0x137   : > { %2442 = vmatpush3.bf16.msra.mxu0 %v2802_v10 }
 0x138   : > { %2466 = vmatpush3.bf16.msra.mxu1 %v2803_v11  ;;  %2443 = vmatprep.subr.bf16.mxu0 %v2804_v14 }
 0x139   : > { %2467 = vmatprep.subr.bf16.mxu1 %v2805_v15 }
 0x13b   : > { %2444 = vmatpush3.bf16.msra.mxu0 %v2804_v14 }
 0x13c   : > { %2468 = vmatpush3.bf16.msra.mxu1 %v2805_v15  ;;  %2445 = vmatprep.subr.bf16.mxu0 %v2806_v16 }
 0x13d   : > { %2469 = vmatprep.subr.bf16.mxu1 %v2807_v17 }
 0x13f   : > { %2446 = vmatpush3.bf16.msra.mxu0 %v2806_v16 }
 0x140   : > { %2470 = vmatpush3.bf16.msra.mxu1 %v2807_v17 }
 0x142   : > { %2448 = vmatmul.mubr.bf16.vlgmr.msra.gmra.mrb[0].mxu0 %v2810_v18 }
 0x143   : > { %2472 = vmatmul.mubr.bf16.vlgmr.msra.gmra.mrb[0].mxu1 %v2811_v19  ;;  %2451 = vmatprep.mubr.bf16.mxu0 %v2812_v20 }
 0x144   : > { %2475 = vmatprep.mubr.bf16.mxu1 %v2813_v21 }
 0x14a   : > { %2452 = vmatmul.mubr.bf16.gmra.mrb[4].mxu0 %v2814_v22 }
 0x14b   : > { %2476 = vmatmul.mubr.bf16.gmra.mrb[4].mxu1 %v2815_v23 }
 0x215   : > { %v2449_v24 = vpop.f32.mrb[0].mxu0 }
 0x216   : > { %v2473_v26 = vpop.f32.mrb[0].mxu1  ;;  %v702_v28 = vpop.f32.mrb[1].mxu0  ;;  %v711_v31 = vadd.f32 %v2449_v24, %v2268_v25 }
 0x217   : > { %v870_v29 = vpop.f32.mrb[1].mxu1  ;;  %v2450_v30 = vpop.f32.mrb[2].mxu0  ;;  %v879_v35 = vadd.f32 %v2473_v26, %v2281_v27  ;;  %v703_v36 = vadd.f32 %v2268_v25, %v702_v28 }
 0x218   : > { %v714_v32 = vadd.f32 %v2450_v30, %v2268_v25  ;;  %v2474_v33 = vpop.f32.mrb[2].mxu1  ;;  %v705_v34 = vpop.f32.mrb[3].mxu0  ;;  %v871_v40 = vadd.f32 %v2281_v27, %v870_v29 }
 0x219   : > { %v882_v37 = vadd.f32 %v2474_v33, %v2281_v27  ;;  %v706_v38 = vadd.f32 %v2268_v25, %v705_v34  ;;  %v873_v39 = vpop.f32.mrb[3].mxu1 }
 0x21a   : > { %v902_v41 = vpack.c.bf16 %v714_v32, %v711_v31  ;;  %v874_v42 = vadd.f32 %v2281_v27, %v873_v39 }
 0x21b   : > { %v910_v43 = vpack.c.bf16 %v882_v37, %v879_v35  ;;  %v901_v44 = vpack.c.bf16 %v706_v38, %v703_v36 }
 0x21c   : > { %906 = vst [vmem:[#allocation2 + $0x8] sm:$0xff] %v902_v41  ;;  %v909_v45 = vpack.c.bf16 %v874_v42, %v871_v40 }
 0x21d   : > { %914 = vst [vmem:[#allocation3 + $0x8] sm:$0xff] %v910_v43  ;;  %905 = vst [vmem:[#allocation2] sm:$0xff] %v901_v44  ;;  %v2453_v46 = vpop.f32.mrb[4].mxu0 }
 0x21e   : > { %913 = vst [vmem:[#allocation3] sm:$0xff] %v909_v45  ;;  %v2477_v47 = vpop.f32.mrb[4].mxu1  ;;  %v718_v48 = vpop.f32.mrb[5].mxu0  ;;  %v727_v51 = vadd.f32 %v2453_v46, %v2268_v25 }
 0x21f   : > { %v886_v49 = vpop.f32.mrb[5].mxu1  ;;  %v2454_v50 = vpop.f32.mrb[6].mxu0  ;;  %v895_v55 = vadd.f32 %v2477_v47, %v2281_v27  ;;  %v719_v56 = vadd.f32 %v2268_v25, %v718_v48 }
 0x220   : > { %v730_v52 = vadd.f32 %v2454_v50, %v2268_v25  ;;  %v2478_v53 = vpop.f32.mrb[6].mxu1  ;;  %v721_v54 = vpop.f32.mrb[7].mxu0  ;;  %v887_v60 = vadd.f32 %v2281_v27, %v886_v49 }
 0x221   : > { %v898_v57 = vadd.f32 %v2478_v53, %v2281_v27  ;;  %v722_v58 = vadd.f32 %v2268_v25, %v721_v54  ;;  %v889_v59 = vpop.f32.mrb[7].mxu1 }
 0x222   : > { %v904_v61 = vpack.c.bf16 %v730_v52, %v727_v51  ;;  %v890_v62 = vadd.f32 %v2281_v27, %v889_v59 }
 0x223   : > { %v912_v63 = vpack.c.bf16 %v898_v57, %v895_v55  ;;  %v903_v0 = vpack.c.bf16 %v722_v58, %v719_v56 }
 0x224   : > { %908 = vst [vmem:[#allocation2 + $0x18] sm:$0xff] %v904_v61  ;;  %v911_v1 = vpack.c.bf16 %v890_v62, %v887_v60 }
 0x225   : > { %916 = vst [vmem:[#allocation3 + $0x18] sm:$0xff] %v912_v63  ;;  %907 = vst [vmem:[#allocation2 + $0x10] sm:$0xff] %v903_v0 }
 0x226   : > { %915 = vst [vmem:[#allocation3 + $0x10] sm:$0xff] %v911_v1 }
 0x227 PF: > { %v2816_v2 = vld [vmem:[#allocation14] sm:$0xff]   ;;  %v2817_v3 = vld [vmem:[#allocation14 + $0x8] sm:$0xff]   ;;  %v2818_v4 = vld [vmem:[#allocation14 + $0x10] sm:$0xff]   ;;  %vm1088_vm0 = vcmask 261120   ;;  %s4159_s1 = sld [smem:[#allocation39_spill]]  ;;  %s4160_s15 = sld [smem:[#allocation26_spill]]  ;;  %v1060_v35 = vlaneseq }
 0x228   : > { %2479 = vmatprep.subr.bf16.mxu0 %v2816_v2  ;;  %v2819_v5 = vld [vmem:[#allocation14 + $0x18] sm:$0xff]   ;;  %v2824_v6 = vld [vmem:[%s3713_s29] sm:$0xff]   ;;  %v2821_v11 = vld [vmem:[#allocation14 + $0x28] sm:$0xff]   ;;  %v3249_v46 = vmov -1e+30   ;;  %vm1156_vm5 = vcmask 523264  }
 0x229   : > { %2480 = vmatpush3.bf16.msra.mxu0 %v2816_v2  ;;  %2495 = vmatprep.mubr.bf16.mxu0 %v2824_v6  ;;  %v3746_v7 = vld [vmem:[#allocation2] sm:$0xff]  ;;  %v3748_v8 = vld [vmem:[#allocation2 + $0x8] sm:$0xff]  ;;  %v2820_v9 = vld [vmem:[#allocation14 + $0x20] sm:$0xff]   ;;  %v1061_v36 = vshrl.u32 %v1060_v35, 7  ;;  %v1071_v42 = vand.u32 127, %v1060_v35  ;;  %s3250_s24 = smov 96  }
 0x22a   : > { %2481 = vmatprep.subr.bf16.mxu0 %v2817_v3  ;;  %2615 = vmatprep.subr.msk.bf16.mxu1 %vm1088_vm0, %v3746_v7  ;;  %v1096_v10 = vsel %vm1088_vm0, %v3746_v7, 0  ;;  %v1099_v12 = vsel %vm1088_vm0, %v3748_v8, 0  ;;  %v2822_v14 = vld [vmem:[#allocation14 + $0x30] sm:$0xff]   ;;  %v2823_v15 = vld [vmem:[#allocation14 + $0x38] sm:$0xff]   ;;  %s3251_s3 = smov 64   ;;  %vm1482_vm6 = vcmask 523520  }
 0x22b   : > { %2500 = vmatpush3.bf16.xpose.msra.mxu1 %v1096_v10  ;;  %v2825_v17 = vld [vmem:[%s3713_s29 + $0x8] sm:$0xff]   ;;  %v1063_v37 = vadd.s32 16, %v1061_v36  ;;  %v1064_v39 = vadd.s32 24, %v1061_v36  ;;  %v1062_v40 = vadd.s32 8, %v1061_v36  ;;  %s3252_s29 = smov 32   ;;  %vm1703_vm7 = vcmask 785920  }
 0x22c   : > { %2616 = vmatprep.subr.msk.bf16.mxu1 %vm1088_vm0, %v3748_v8  ;;  %v3758_v13 = vld [vmem:[#allocation2 + $0x10] sm:$0xff]  ;;  %v3765_v18 = vld [vmem:[#allocation2 + $0x18] sm:$0xff]  ;;  %s4161_s12 = sld [smem:[#allocation27_spill]]  ;;  %vm1924_vm8 = vcmask 1048320   ;;  %s4162_s7 = sld [smem:[#allocation40_spill]] }
 0x22d   : > { %2482 = vmatpush3.bf16.msra.mxu0 %v2817_v3  ;;  %v1102_v16 = vsel %vm1088_vm0, %v3758_v13, 0  ;;  %v1105_v19 = vsel %vm1088_vm0, %v3765_v18, 0  ;;  %v2294_v20 = vld [vmem:[%s4159_s1] ss:$0 sm:$0xff]  ;;  %s2305_s30 = sshll.u32 %s4160_s15, 5  ;;  %s2332_s14 = sshll.u32 %s4160_s15, 2 }
 0x22e   : > { %2483 = vmatprep.subr.bf16.mxu0 %v2818_v4  ;;  %v1065_v38 = vstv %s2305_s30  ;;  %s2069_s10 = sshll.u32 %s3728_s13, 4  ;;  %s4163_s15 = sld [smem:[#allocation41_spill]]  ;;  %s3993_s10 = int_to_ptr.vmem [resolvable:$true] %s2069_s10 }
 0x22f   : > { %v1068_v41 = vadd.s32 %v1065_v38, %v1063_v37  ;;  %v1066_v43 = vadd.s32 %v1065_v38, %v1061_v36  ;;  %v1069_v44 = vadd.s32 %v1065_v38, %v1064_v39  ;;  %v1067_v45 = vadd.s32 %v1065_v38, %v1062_v40 }
 0x231   : > { %2484 = vmatpush3.bf16.msra.mxu0 %v2818_v4  ;;  %vm1074_vm1 = vcmp.le.s32.totalorder %v1071_v42, %v1068_v41  ;;  %vm1072_vm2 = vcmp.le.s32.totalorder %v1071_v42, %v1066_v43  ;;  %vm1075_vm3 = vcmp.le.s32.totalorder %v1071_v42, %v1069_v44  ;;  %vm1073_vm4 = vcmp.le.s32.totalorder %v1071_v42, %v1067_v45 }
 0x232   : > { %2485 = vmatprep.subr.bf16.mxu0 %v2819_v5  ;;  %v3783_v47 = vsel %vm1074_vm1, 0.0, %v3249_v46  ;;  %v3785_v48 = vsel %vm1072_vm2, 0.0, %v3249_v46  ;;  %v3787_v50 = vsel %vm1075_vm3, 0.0, %v3249_v46  ;;  %v3790_v53 = vsel %vm1073_vm4, 0.0, %v3249_v46  ;;  %s2333_s28 = sshll.u32 %s4161_s12, 3 }
 0x233   : > { %2502 = vmatpush3.bf16.xpose.msra.mxu1 %v1099_v12  ;;  %s2066_s6 = sadd.s32 %s2333_s28, %s2332_s14 }
 0x234   : > { %2617 = vmatprep.subr.msk.bf16.mxu1 %vm1088_vm0, %v3758_v13  ;;  %s2334_s11 = sshll.u32 %s2066_s6, 7 }
 0x235   : > { %2486 = vmatpush3.bf16.msra.mxu0 %v2819_v5  ;;  %s3991_s30 = scalar_lea.hbm %s4163_s15, %s2334_s11 }
 0x236   : > { %2487 = vmatprep.subr.bf16.mxu0 %v2820_v9 }
 0x239   : > { %2488 = vmatpush3.bf16.msra.mxu0 %v2820_v9 }
 0x23a   : > { %2489 = vmatprep.subr.bf16.mxu0 %v2821_v11 }
 0x23b   : > { %2504 = vmatpush3.bf16.xpose.msra.mxu1 %v1102_v16 }
 0x23c   : > { %2618 = vmatprep.subr.msk.bf16.mxu1 %vm1088_vm0, %v3765_v18 }
 0x23d   : > { %2490 = vmatpush3.bf16.msra.mxu0 %v2821_v11 }
 0x23e   : > { %2491 = vmatprep.subr.bf16.mxu0 %v2822_v14 }
 0x241   : > { %2492 = vmatpush3.bf16.msra.mxu0 %v2822_v14 }
 0x242   : > { %2493 = vmatprep.subr.bf16.mxu0 %v2823_v15 }
 0x243   : > { %2506 = vmatpush3.bf16.xpose.msra.mxu1 %v1105_v19 }
 0x245   : > { %2494 = vmatpush3.bf16.msra.mxu0 %v2823_v15 }
 0x248   : > { %2496 = vmatmul.mubr.bf16.vlgmr.msra.gmra.mrb[0].mxu0 %v2825_v17 }
 0x31b   : > { %v2497_v21 = vpop.f32.mrb[0].mxu0 }
 0x31c   : > { %v1047_v22 = vadd.f32 %v2497_v21, %v2294_v20  ;;  %v1038_v23 = vpop.f32.mrb[1].mxu0 }
 0x31d   : > { %v1039_v24 = vadd.f32 %v2294_v20, %v1038_v23  ;;  %v2498_v25 = vpop.f32.mrb[2].mxu0  ;;  %v3803_v23 = vld [vmem:[#allocation3] sm:$0xff] }
 0x31e   : > { %v1050_v26 = vadd.f32 %v2498_v25, %v2294_v20  ;;  %v1041_v27 = vpop.f32.mrb[3].mxu0  ;;  %v1055_v29 = vmul.f32 0.17677669, %v1047_v22  ;;  %2511 = vmatprep.subr.bf16.mxu1 %v3803_v23  ;;  %v3811_v25 = vld [vmem:[#allocation3 + $0x10] sm:$0xff] }
 0x31f   : > { %v1042_v28 = vadd.f32 %v2294_v20, %v1041_v27  ;;  %v1053_v31 = vmul.f32 0.17677669, %v1039_v24  ;;  %v3807_v24 = vld [vmem:[#allocation3 + $0x8] sm:$0xff] }
 0x320   : > { %v1056_v30 = vmul.f32 0.17677669, %v1050_v26  ;;  %v3819_v26 = vld [vmem:[#allocation3 + $0x18] sm:$0xff] }
 0x321   : > { %v1054_v32 = vmul.f32 0.17677669, %v1042_v28 }
 0x322   : > { %v3774_v33 = vpack.c.bf16 %v1056_v30, %v1055_v29 }
 0x323   : > { %v3776_v34 = vpack.c.bf16 %v1054_v32, %v1053_v31 }
 0x325   : > { %2507 = vmatprep.mubr.msk.bf16.mxu1 %vm1088_vm0, %v3776_v34 }
 0x326   : > { %2508 = vmatmul.mubr.msk.bf16.vlgmr.msra.gmra.mrb[0].mxu1 %vm1088_vm0, %v3774_v33 }
 0x327   : > { %2512 = vmatpush3.bf16.msra.mxu1 %v3803_v23 }
 0x328   : > { %2513 = vmatprep.subr.bf16.mxu1 %v3807_v24 }
 0x32b   : > { %2514 = vmatpush3.bf16.msra.mxu1 %v3807_v24 }
 0x32c   : > { %2515 = vmatprep.subr.bf16.mxu1 %v3811_v25 }
 0x32f   : > { %2516 = vmatpush3.bf16.msra.mxu1 %v3811_v25 }
 0x330   : > { %2517 = vmatprep.subr.bf16.mxu1 %v3819_v26 }
 0x333   : > { %2518 = vmatpush3.bf16.msra.mxu1 %v3819_v26 }
 0x3f9   : > { %v2509_v49 = vpop.f32.mrb[0].mxu1 }
 0x3fa   : > { %v1150_v51 = vadd.f32 %v2509_v49, %v3783_v47  ;;  %v1141_v52 = vpop.f32.mrb[1].mxu1 }
 0x3fb   : > { %v1142_v54 = vadd.f32 %v1141_v52, %v3785_v48  ;;  %v2510_v55 = vpop.f32.mrb[2].mxu1 }
 0x3fc   : > { %v1153_v56 = vadd.f32 %v2510_v55, %v3787_v50  ;;  %v1144_v57 = vpop.f32.mrb[3].mxu1  ;;  %v1163_v58 = vsel %vm1156_vm5, %v1150_v51, -inf }
 0x3fd   : > { %v1145_v59 = vadd.f32 %v1144_v57, %v3790_v53  ;;  %1164 = vmax.xlane.f32.xlu1 %v1163_v58  ;;  %v1157_v60 = vsel %vm1156_vm5, %v1142_v54, -inf }
 0x3fe   : > { %1158 = vmax.xlane.f32.xlu0 %v1157_v60  ;;  %v1166_v61 = vsel %vm1156_vm5, %v1153_v56, -inf }
 0x3ff   : > { %v1160_v62 = vsel %vm1156_vm5, %v1145_v59, -inf }
 0x401   : > { %1167 = vmax.xlane.f32.xlu1 %v1166_v61 }
 0x402   : > { %1161 = vmax.xlane.f32.xlu0 %v1160_v62 }
 0x48a   : > { %v1165_v63 = vpop.xlane.xlu1 %1164 }
 0x48b   : > { %v1171_v0 = vsub.f32 %v1150_v51, %v1165_v63  ;;  %v1159_v1 = vpop.xlane.xlu0 %1158 }
 0x48c   : > { %v1169_v2 = vsub.f32 %v1142_v54, %v1159_v1 }
 0x48d   : > { %v1177_v3 = vmul.f32 1.442695, %v1171_v0 }
 0x48e   : > { %v1173_v4 = vmul.f32 1.442695, %v1169_v2  ;;  %v1168_v5 = vpop.xlane.xlu1 %1167 }
 0x48f   : > { %2834 = vpow2.f32 %v1177_v3  ;;  %v1172_v6 = vsub.f32 %v1153_v56, %v1168_v5  ;;  %v1162_v9 = vpop.xlane.xlu0 %1161 }
 0x490   : > { %v1170_v10 = vsub.f32 %v1145_v59, %v1162_v9  ;;  %2836 = vpow2.f32 %v1173_v4 }
 0x491   : > { %v1179_v11 = vmul.f32 1.442695, %v1172_v6 }
 0x492   : > { %v1175_v12 = vmul.f32 1.442695, %v1170_v10 }
 0x494   : > { %2838 = vpow2.f32 %v1175_v12 }
 0x495   : > { %2840 = vpow2.f32 %v1179_v11 }
 0x499   : > { %v2835_v14 = vpop.eup %2834 }
 0x49a   : > { %v1187_v15 = vsel %vm1156_vm5, %v2835_v14, 0.0  ;;  %v2837_v16 = vpop.eup %2836 }
 0x49b   : > { %1188 = vadd.xlane.f32.xlu0 %v1187_v15  ;;  %v1181_v19 = vsel %vm1156_vm5, %v2837_v16, 0.0 }
 0x49e   : > { %v2839_v17 = vpop.eup %2838 }
 0x49f   : > { %1182 = vadd.xlane.f32.xlu0 %v1181_v19  ;;  %v1184_v20 = vsel %vm1156_vm5, %v2839_v17, 0.0  ;;  %v2841_v21 = vpop.eup %2840 }
 0x4a0   : > { %1185 = vadd.xlane.f32.xlu1 %v1184_v20  ;;  %v1190_v22 = vsel %vm1156_vm5, %v2841_v21, 0.0 }
 0x4a4   : > { %1191 = vadd.xlane.f32.xlu1 %v1190_v22 }
 0x4b5   : > { %1280 = vrot.lane.b32.xlu0 %v3746_v7, %s3250_s24  ;;  %1282 = vrot.lane.b32.xlu1 %v3748_v8, %s3250_s24 }
 0x4b9   : > { %1272 = vrot.lane.b32.xlu0 %v3776_v34, %s3250_s24  ;;  %1284 = vrot.lane.b32.xlu1 %v3758_v13, %s3250_s24 }
 0x4bd   : > { %1286 = vrot.lane.b32.xlu1 %v3765_v18, %s3250_s24 }
 0x4c1   : > { %1274 = vrot.lane.b32.xlu1 %v3774_v33, %s3250_s24 }
 0x528   : > { %v1189_v27 = vpop.xlane.xlu0 %1188 }
 0x52c   : > { %v1183_v28 = vpop.xlane.xlu0 %1182 }
 0x52d   : > { %2842 = vrcp.f32 %v1183_v28  ;;  %v1186_v29 = vpop.xlane.xlu1 %1185 }
 0x52e   : > { %2844 = vrcp.f32 %v1186_v29 }
 0x52f   : > { %2846 = vrcp.f32 %v1189_v27 }
 0x530   : > { %v1281_v30 = vpop.permute.xlu0 %1280 }
 0x531   : > { %v1192_v31 = vpop.xlane.xlu1 %1191  ;;  %2619 = vmatprep.subr.msk.bf16.mxu1 %vm1088_vm0, %v1281_v30  ;;  %v1295_v43 = vsel %vm1088_vm0, %v1281_v30, 0 }
 0x532   : > { %2848 = vrcp.f32 %v1192_v31 }
 0x534   : > { %v1273_v45 = vpop.permute.xlu0 %1272 }
 0x535   : > { %v1283_v46 = vpop.permute.xlu1 %1282 }
 0x536   : > { %v1298_v49 = vsel %vm1088_vm0, %v1283_v46, 0 }
 0x537   : > { %v2843_v32 = vpop.eup %2842 }
 0x538   : > { %v2845_v35 = vpop.eup %2844  ;;  %v1197_v36 = vmul.f32 %v2843_v32, %v2837_v16 }
 0x539   : > { %v1198_v37 = vmul.f32 %v2845_v35, %v2839_v17  ;;  %v2847_v38 = vpop.eup %2846  ;;  %v1285_v51 = vpop.permute.xlu1 %1284 }
 0x53a   : > { %v1199_v41 = vmul.f32 %v2847_v38, %v2835_v14  ;;  %v1301_v52 = vsel %vm1088_vm0, %v1285_v51, 0 }
 0x53b   : > { %v1201_v39 = vpack.c.bf16 %v1198_v37, %v1197_v36 }
 0x53c   : > { %v2849_v40 = vpop.eup %2848 }
 0x53d   : > { %v1200_v42 = vmul.f32 %v2849_v40, %v2841_v21  ;;  %2519 = vmatprep.mubr.msk.bf16.mxu1 %vm1156_vm5, %v1201_v39  ;;  %v1287_v54 = vpop.permute.xlu1 %1286 }
 0x53e   : > { %v1304_v55 = vsel %vm1088_vm0, %v1287_v54, 0 }
 0x53f   : > { %v1202_v44 = vpack.c.bf16 %v1200_v42, %v1199_v41 }
 0x541   : > { %2520 = vmatmul.mubr.msk.bf16.vlgmr.msra.gmra.mrb[4].mxu1 %vm1156_vm5, %v1202_v44  ;;  %v1275_v56 = vpop.permute.xlu1 %1274 }
 0x542   : > { %2524 = vmatpush3.bf16.xpose.msra.mxu1 %v1295_v43  ;;  %2531 = vmatprep.mubr.msk.bf16.mxu1 %vm1088_vm0, %v1273_v45 }
 0x543   : > { %2620 = vmatprep.subr.msk.bf16.mxu1 %vm1088_vm0, %v1283_v46 }
 0x54a   : > { %2526 = vmatpush3.bf16.xpose.msra.mxu1 %v1298_v49 }
 0x54b   : > { %2621 = vmatprep.subr.msk.bf16.mxu1 %vm1088_vm0, %v1285_v51 }
 0x552   : > { %2528 = vmatpush3.bf16.xpose.msra.mxu1 %v1301_v52 }
 0x553   : > { %2622 = vmatprep.subr.msk.bf16.mxu1 %vm1088_vm0, %v1287_v54 }
 0x55a   : > { %2530 = vmatpush3.bf16.xpose.msra.mxu1 %v1304_v55 }
 0x561   : > { %2532 = vmatmul.mubr.msk.bf16.vlgmr.msra.gmra.mrb[8].mxu1 %vm1088_vm0, %v1275_v56 }
 0x614   : > { %v2521_v57 = vpop.f32.mrb[4].mxu1 }
 0x615   : > { %v1243_v58 = vpop.f32.mrb[5].mxu1 }
 0x616   : > { %v2522_v59 = vpop.f32.mrb[6].mxu1 }
 0x617   : > { %v1259_v60 = vpack.c.bf16 %v2522_v59, %v2521_v57  ;;  %v1246_v61 = vpop.f32.mrb[7].mxu1 }
 0x618   : > { %v1258_v62 = vpack.c.bf16 %v1246_v61, %v1243_v58 }
 0x619   : > { %1261 = vst.msk [vmem:[#allocation4 + $0x8] sm:$0xff] %vm1088_vm0, %v1259_v60 }
 0x61a   : > { %1260 = vst.msk [vmem:[#allocation4] sm:$0xff] %vm1088_vm0, %v1258_v62 }
 0x634   : > { %v2533_v63 = vpop.f32.mrb[8].mxu1 }
 0x635   : > { %v1340_v0 = vpop.f32.mrb[9].mxu1  ;;  %v1349_v4 = vadd.f32 %v2533_v63, %v3783_v47 }
 0x636   : > { %v1341_v1 = vadd.f32 %v1340_v0, %v3785_v48  ;;  %v2534_v2 = vpop.f32.mrb[10].mxu1 }
 0x637   : > { %v1343_v3 = vpop.f32.mrb[11].mxu1  ;;  %v1352_v10 = vadd.f32 %v2534_v2, %v3787_v50  ;;  %v1361_v11 = vsel %vm1156_vm5, %v1349_v4, -inf }
 0x638   : > { %v1344_v5 = vadd.f32 %v1343_v3, %v3790_v53  ;;  %v1355_v6 = vsel %vm1156_vm5, %v1341_v1, -inf }
 0x639   : > { %1356 = vmax.xlane.f32.xlu0 %v1355_v6  ;;  %v1364_v12 = vsel %vm1156_vm5, %v1352_v10, -inf }
 0x63a   : > { %v1358_v9 = vsel %vm1156_vm5, %v1344_v5, -inf }
 0x63b   : > { %1359 = vmax.xlane.f32.xlu1 %v1358_v9 }
 0x63d   : > { %1362 = vmax.xlane.f32.xlu0 %v1361_v11 }
 0x641   : > { %1365 = vmax.xlane.f32.xlu0 %v1364_v12 }
 0x64c   : > { %1407 = vrot.lane.b32.xlu1 %v3807_v24, %s3250_s24 }
 0x650   : > { %1409 = vrot.lane.b32.xlu1 %v3811_v25, %s3250_s24 }
 0x657   : > { %1405 = vrot.lane.b32.xlu0 %v3803_v23, %s3250_s24 }
 0x6c6   : > { %v1357_v14 = vpop.xlane.xlu0 %1356 }
 0x6c7   : > { %v1367_v15 = vsub.f32 %v1341_v1, %v1357_v14 }
 0x6c8   : > { %v1360_v16 = vpop.xlane.xlu1 %1359 }
 0x6c9   : > { %v1371_v20 = vmul.f32 1.442695, %v1367_v15  ;;  %v1368_v21 = vsub.f32 %v1344_v5, %v1360_v16 }
 0x6ca   : > { %v1363_v17 = vpop.xlane.xlu0 %1362 }
 0x6cb   : > { %v1369_v19 = vsub.f32 %v1349_v4, %v1363_v17  ;;  %v1373_v30 = vmul.f32 1.442695, %v1368_v21 }
 0x6cc   : > { %v1408_v29 = vpop.permute.xlu1 %1407 }
 0x6cd   : > { %v1375_v22 = vmul.f32 1.442695, %v1369_v19 }
 0x6ce   : > { %v1366_v27 = vpop.xlane.xlu0 %1365 }
 0x6cf   : > { %2850 = vpow2.f32 %v1375_v22  ;;  %v1370_v28 = vsub.f32 %v1352_v10, %v1366_v27 }
 0x6d0   : > { %2852 = vpow2.f32 %v1371_v20  ;;  %v1410_v35 = vpop.permute.xlu1 %1409 }
 0x6d1   : > { %v1377_v31 = vmul.f32 1.442695, %v1370_v28 }
 0x6d2   : > { %v1406_v32 = vpop.permute.xlu0 %1405 }
 0x6d3   : > { %2854 = vpow2.f32 %v1377_v31  ;;  %2535 = vmatprep.subr.bf16.mxu0 %v1406_v32 }
 0x6d4   : > { %2536 = vmatpush3.bf16.msra.mxu0 %v1406_v32  ;;  %2856 = vpow2.f32 %v1373_v30 }
 0x6d5   : > { %2537 = vmatprep.subr.bf16.mxu0 %v1408_v29 }
 0x6d8   : > { %2538 = vmatpush3.bf16.msra.mxu0 %v1408_v29 }
 0x6d9   : > { %v2851_v36 = vpop.eup %2850  ;;  %2539 = vmatprep.subr.bf16.mxu0 %v1410_v35 }
 0x6da   : > { %v1385_v37 = vsel %vm1156_vm5, %v2851_v36, 0.0  ;;  %v2853_v38 = vpop.eup %2852 }
 0x6db   : > { %1386 = vadd.xlane.f32.xlu0 %v1385_v37  ;;  %v1379_v40 = vsel %vm1156_vm5, %v2853_v38, 0.0 }
 0x6dc   : > { %2540 = vmatpush3.bf16.msra.mxu0 %v1410_v35 }
 0x6dd   : > { %v2855_v39 = vpop.eup %2854 }
 0x6de   : > { %v1388_v41 = vsel %vm1156_vm5, %v2855_v39, 0.0  ;;  %v2857_v42 = vpop.eup %2856 }
 0x6df   : > { %1380 = vadd.xlane.f32.xlu0 %v1379_v40  ;;  %1389 = vadd.xlane.f32.xlu1 %v1388_v41  ;;  %v1382_v43 = vsel %vm1156_vm5, %v2857_v42, 0.0 }
 0x6e3   : > { %1383 = vadd.xlane.f32.xlu1 %v1382_v43 }
 0x6f4   : > { %1411 = vrot.lane.b32.xlu1 %v3819_v26, %s3250_s24 }
 0x6f5   : > { %1501 = vrot.lane.b32.xlu0 %v3746_v7, %s3251_s3 }
 0x6f8   : > { %1503 = vrot.lane.b32.xlu1 %v3748_v8, %s3251_s3 }
 0x6f9   : > { %1505 = vrot.lane.b32.xlu0 %v3758_v13, %s3251_s3 }
 0x6fc   : > { %1507 = vrot.lane.b32.xlu1 %v3765_v18, %s3251_s3 }
 0x6fd   : > { %1493 = vrot.lane.b32.xlu0 %v3776_v34, %s3251_s3 }
 0x700   : > { %1495 = vrot.lane.b32.xlu1 %v3774_v33, %s3251_s3 }
 0x768   : > { %v1387_v44 = vpop.xlane.xlu0 %1386 }
 0x76c   : > { %v1390_v45 = vpop.xlane.xlu1 %1389  ;;  %v1381_v46 = vpop.xlane.xlu0 %1380 }
 0x76d   : > { %2858 = vrcp.f32 %v1390_v45 }
 0x76e   : > { %2860 = vrcp.f32 %v1381_v46 }
 0x76f   : > { %2862 = vrcp.f32 %v1387_v44 }
 0x770   : > { %v1384_v49 = vpop.xlane.xlu1 %1383  ;;  %v1502_v52 = vpop.permute.xlu0 %1501 }
 0x771   : > { %2864 = vrcp.f32 %v1384_v49  ;;  %v1516_v0 = vsel %vm1088_vm0, %v1502_v52, 0 }
 0x774   : > { %v1412_v51 = vpop.permute.xlu1 %1411  ;;  %v1506_v59 = vpop.permute.xlu0 %1505 }
 0x775   : > { %2541 = vmatprep.subr.bf16.mxu0 %v1412_v51  ;;  %v1522_v5 = vsel %vm1088_vm0, %v1506_v59, 0 }
 0x776   : > { %2542 = vmatpush3.bf16.msra.mxu0 %v1412_v51 }
 0x777   : > { %2623 = vmatprep.subr.msk.bf16.mxu0 %vm1088_vm0, %v1502_v52  ;;  %v2859_v54 = vpop.eup %2858 }
 0x778   : > { %v2861_v55 = vpop.eup %2860  ;;  %v1398_v58 = vmul.f32 %v2859_v54, %v2855_v39  ;;  %v1494_v2 = vpop.permute.xlu0 %1493 }
 0x779   : > { %v2863_v56 = vpop.eup %2862  ;;  %v1395_v60 = vmul.f32 %v2861_v55, %v2853_v38  ;;  %v1504_v3 = vpop.permute.xlu1 %1503 }
 0x77a   : > { %v1397_v62 = vmul.f32 %v2863_v56, %v2851_v36  ;;  %v1519_v4 = vsel %vm1088_vm0, %v1504_v3, 0 }
 0x77b   : > { %v2865_v57 = vpop.eup %2864 }
 0x77c   : > { %v1396_v61 = vmul.f32 %v2865_v57, %v2857_v42  ;;  %v1400_v1 = vpack.c.bf16 %v1398_v58, %v1397_v62 }
 0x77d   : > { %v1508_v6 = vpop.permute.xlu1 %1507 }
 0x77e   : > { %v1399_v63 = vpack.c.bf16 %v1396_v61, %v1395_v60  ;;  %v1525_v9 = vsel %vm1088_vm0, %v1508_v6, 0 }
 0x780   : > { %2543 = vmatprep.mubr.msk.bf16.mxu0 %vm1156_vm5, %v1399_v63 }
 0x781   : > { %2544 = vmatmul.mubr.msk.bf16.vlgmr.msra.gmra.mrb[4].mxu0 %vm1156_vm5, %v1400_v1  ;;  %v1496_v10 = vpop.permute.xlu1 %1495 }
 0x782   : > { %2548 = vmatpush3.bf16.xpose.msra.mxu0 %v1516_v0  ;;  %2555 = vmatprep.mubr.msk.bf16.mxu0 %vm1088_vm0, %v1494_v2 }
 0x783   : > { %2624 = vmatprep.subr.msk.bf16.mxu0 %vm1088_vm0, %v1504_v3 }
 0x78a   : > { %2550 = vmatpush3.bf16.xpose.msra.mxu0 %v1519_v4 }
 0x78b   : > { %2625 = vmatprep.subr.msk.bf16.mxu0 %vm1088_vm0, %v1506_v59 }
 0x792   : > { %2552 = vmatpush3.bf16.xpose.msra.mxu0 %v1522_v5 }
 0x793   : > { %2626 = vmatprep.subr.msk.bf16.mxu0 %vm1088_vm0, %v1508_v6 }
 0x79a   : > { %2554 = vmatpush3.bf16.xpose.msra.mxu0 %v1525_v9 }
 0x7a1   : > { %2556 = vmatmul.mubr.msk.bf16.vlgmr.msra.gmra.mrb[8].mxu0 %vm1088_vm0, %v1496_v10 }
 0x854   : > { %v3889_v11 = vpop.f32.mrb[4].mxu0 }
 0x855   : > { %v3891_v12 = vpop.f32.mrb[5].mxu0 }
 0x856   : > { %v3893_v14 = vpop.f32.mrb[6].mxu0 }
 0x857   : > { %v1473_v15 = vpack.c.bf16 %v3893_v14, %v3889_v11  ;;  %v3897_v16 = vpop.f32.mrb[7].mxu0 }
 0x858   : > { %v1472_v17 = vpack.c.bf16 %v3897_v16, %v3891_v12 }
 0x874   : > { %v2557_v19 = vpop.f32.mrb[8].mxu0 }
 0x875   : > { %v1561_v20 = vpop.f32.mrb[9].mxu0  ;;  %v1570_v28 = vadd.f32 %v2557_v19, %v3783_v47 }
 0x876   : > { %v1562_v21 = vadd.f32 %v1561_v20, %v3785_v48  ;;  %v2558_v22 = vpop.f32.mrb[10].mxu0 }
 0x877   : > { %v1564_v27 = vpop.f32.mrb[11].mxu0  ;;  %v1573_v32 = vadd.f32 %v2558_v22, %v3787_v50  ;;  %v1582_v35 = vsel %vm1156_vm5, %v1570_v28, -inf }
 0x878   : > { %v1565_v29 = vadd.f32 %v1564_v27, %v3790_v53  ;;  %v1576_v30 = vsel %vm1156_vm5, %v1562_v21, -inf }
 0x879   : > { %1577 = vmax.xlane.f32.xlu0 %v1576_v30  ;;  %v1585_v36 = vsel %vm1156_vm5, %v1573_v32, -inf }
 0x87a   : > { %v1579_v31 = vsel %vm1156_vm5, %v1565_v29, -inf }
 0x87b   : > { %1580 = vmax.xlane.f32.xlu1 %v1579_v31 }
 0x87d   : > { %1583 = vmax.xlane.f32.xlu0 %v1582_v35 }
 0x881   : > { %1586 = vmax.xlane.f32.xlu0 %v1585_v36 }
 0x88c   : > { %1628 = vrot.lane.b32.xlu1 %v3807_v24, %s3251_s3 }
 0x890   : > { %1630 = vrot.lane.b32.xlu1 %v3811_v25, %s3251_s3 }
 0x897   : > { %1626 = vrot.lane.b32.xlu0 %v3803_v23, %s3251_s3 }
 0x906   : > { %v1578_v37 = vpop.xlane.xlu0 %1577 }
 0x907   : > { %v1588_v38 = vsub.f32 %v1562_v21, %v1578_v37 }
 0x908   : > { %v1581_v39 = vpop.xlane.xlu1 %1580 }
 0x909   : > { %v1592_v42 = vmul.f32 1.442695, %v1588_v38  ;;  %v1589_v43 = vsub.f32 %v1565_v29, %v1581_v39 }
 0x90a   : > { %v1584_v40 = vpop.xlane.xlu0 %1583 }
 0x90b   : > { %v1590_v41 = vsub.f32 %v1570_v28, %v1584_v40  ;;  %v1594_v51 = vmul.f32 1.442695, %v1589_v43 }
 0x90c   : > { %v1629_v49 = vpop.permute.xlu1 %1628 }
 0x90d   : > { %v1596_v44 = vmul.f32 1.442695, %v1590_v41 }
 0x90e   : > { %v1587_v45 = vpop.xlane.xlu0 %1586 }
 0x90f   : > { %2866 = vpow2.f32 %v1596_v44  ;;  %v1591_v46 = vsub.f32 %v1573_v32, %v1587_v45 }
 0x910   : > { %2868 = vpow2.f32 %v1592_v42  ;;  %v1631_v55 = vpop.permute.xlu1 %1630 }
 0x911   : > { %v1598_v52 = vmul.f32 1.442695, %v1591_v46 }
 0x912   : > { %v1627_v54 = vpop.permute.xlu0 %1626 }
 0x913   : > { %2870 = vpow2.f32 %v1598_v52  ;;  %2559 = vmatprep.subr.bf16.mxu1 %v1627_v54 }
 0x914   : > { %2560 = vmatpush3.bf16.msra.mxu1 %v1627_v54  ;;  %2872 = vpow2.f32 %v1594_v51 }
 0x915   : > { %2561 = vmatprep.subr.bf16.mxu1 %v1629_v49 }
 0x918   : > { %2562 = vmatpush3.bf16.msra.mxu1 %v1629_v49 }
 0x919   : > { %v2867_v56 = vpop.eup %2866  ;;  %2563 = vmatprep.subr.bf16.mxu1 %v1631_v55 }
 0x91a   : > { %v1606_v57 = vsel %vm1156_vm5, %v2867_v56, 0.0  ;;  %v2869_v58 = vpop.eup %2868 }
 0x91b   : > { %1607 = vadd.xlane.f32.xlu0 %v1606_v57  ;;  %v1600_v60 = vsel %vm1156_vm5, %v2869_v58, 0.0 }
 0x91c   : > { %2564 = vmatpush3.bf16.msra.mxu1 %v1631_v55 }
 0x91d   : > { %v2871_v59 = vpop.eup %2870 }
 0x91e   : > { %v1609_v61 = vsel %vm1156_vm5, %v2871_v59, 0.0  ;;  %v2873_v62 = vpop.eup %2872 }
 0x91f   : > { %1601 = vadd.xlane.f32.xlu0 %v1600_v60  ;;  %1610 = vadd.xlane.f32.xlu1 %v1609_v61  ;;  %v1603_v63 = vsel %vm1156_vm5, %v2873_v62, 0.0 }
 0x923   : > { %1604 = vadd.xlane.f32.xlu1 %v1603_v63 }
 0x934   : > { %1632 = vrot.lane.b32.xlu1 %v3819_v26, %s3251_s3 }
 0x935   : > { %1722 = vrot.lane.b32.xlu0 %v3746_v7, %s3252_s29 }
 0x938   : > { %1724 = vrot.lane.b32.xlu1 %v3748_v8, %s3252_s29 }
 0x939   : > { %1726 = vrot.lane.b32.xlu0 %v3758_v13, %s3252_s29 }
 0x93c   : > { %1728 = vrot.lane.b32.xlu1 %v3765_v18, %s3252_s29 }
 0x93d   : > { %1714 = vrot.lane.b32.xlu0 %v3776_v34, %s3252_s29 }
 0x940   : > { %1716 = vrot.lane.b32.xlu1 %v3774_v33, %s3252_s29 }
 0x9a8   : > { %v1608_v0 = vpop.xlane.xlu0 %1607 }
 0x9ac   : > { %v1611_v1 = vpop.xlane.xlu1 %1610  ;;  %v1602_v2 = vpop.xlane.xlu0 %1601 }
 0x9ad   : > { %2874 = vrcp.f32 %v1611_v1 }
 0x9ae   : > { %2876 = vrcp.f32 %v1602_v2 }
 0x9af   : > { %2878 = vrcp.f32 %v1608_v0 }
 0x9b0   : > { %v1605_v7 = vpop.xlane.xlu1 %1604  ;;  %v1723_v3 = vpop.permute.xlu0 %1722 }
 0x9b1   : > { %2880 = vrcp.f32 %v1605_v7  ;;  %v1737_v20 = vsel %vm1088_vm0, %v1723_v3, 0 }
 0x9b4   : > { %v1633_v8 = vpop.permute.xlu1 %1632  ;;  %v1727_v33 = vpop.permute.xlu0 %1726 }
 0x9b5   : > { %2565 = vmatprep.subr.bf16.mxu1 %v1633_v8  ;;  %v1743_v29 = vsel %vm1088_vm0, %v1727_v33, 0 }
 0x9b6   : > { %2566 = vmatpush3.bf16.msra.mxu1 %v1633_v8 }
 0x9b7   : > { %2627 = vmatprep.subr.msk.bf16.mxu1 %vm1088_vm0, %v1723_v3  ;;  %v2875_v13 = vpop.eup %2874 }
 0x9b8   : > { %v2877_v18 = vpop.eup %2876  ;;  %v1619_v5 = vmul.f32 %v2875_v13, %v2871_v59  ;;  %v1715_v22 = vpop.permute.xlu0 %1714 }
 0x9b9   : > { %v2879_v34 = vpop.eup %2878  ;;  %v1616_v6 = vmul.f32 %v2877_v18, %v2869_v58  ;;  %v1725_v27 = vpop.permute.xlu1 %1724 }
 0x9ba   : > { %v1618_v10 = vmul.f32 %v2879_v34, %v2867_v56  ;;  %v1740_v28 = vsel %vm1088_vm0, %v1725_v27, 0 }
 0x9bb   : > { %v2881_v4 = vpop.eup %2880 }
 0x9bc   : > { %v1617_v9 = vmul.f32 %v2881_v4, %v2873_v62  ;;  %v1621_v21 = vpack.c.bf16 %v1619_v5, %v1618_v10 }
 0x9bd   : > { %v1729_v30 = vpop.permute.xlu1 %1728 }
 0x9be   : > { %v1620_v19 = vpack.c.bf16 %v1617_v9, %v1616_v6  ;;  %v1746_v31 = vsel %vm1088_vm0, %v1729_v30, 0 }
 0x9c0   : > { %2567 = vmatprep.mubr.msk.bf16.mxu1 %vm1156_vm5, %v1620_v19 }
 0x9c1   : > { %2568 = vmatmul.mubr.msk.bf16.vlgmr.msra.gmra.mrb[12].mxu1 %vm1156_vm5, %v1621_v21  ;;  %v1717_v32 = vpop.permute.xlu1 %1716 }
 0x9c2   : > { %2572 = vmatpush3.bf16.xpose.msra.mxu1 %v1737_v20  ;;  %2579 = vmatprep.mubr.msk.bf16.mxu1 %vm1088_vm0, %v1715_v22 }
 0x9c3   : > { %2628 = vmatprep.subr.msk.bf16.mxu1 %vm1088_vm0, %v1725_v27 }
 0x9ca   : > { %2574 = vmatpush3.bf16.xpose.msra.mxu1 %v1740_v28 }
 0x9cb   : > { %2629 = vmatprep.subr.msk.bf16.mxu1 %vm1088_vm0, %v1727_v33 }
 0x9d2   : > { %2576 = vmatpush3.bf16.xpose.msra.mxu1 %v1743_v29  ;;  %v2826_v29 = vld [vmem:[#allocation16] sm:$0xff]  }
 0x9d3   : > { %2630 = vmatprep.subr.msk.bf16.mxu1 %vm1088_vm0, %v1729_v30  ;;  %v2827_v30 = vld [vmem:[#allocation16 + $0x8] sm:$0xff]  }
 0x9da   : > { %2578 = vmatpush3.bf16.xpose.msra.mxu1 %v1746_v31  ;;  %v2828_v31 = vld [vmem:[#allocation16 + $0x10] sm:$0xff]  }
 0x9e1   : > { %2580 = vmatmul.mubr.msk.bf16.vlgmr.msra.gmra.mrb[16].mxu1 %vm1088_vm0, %v1717_v32  ;;  %v2829_v32 = vld [vmem:[#allocation16 + $0x18] sm:$0xff]  }
 0xa94   : > { %v2569_v35 = vpop.f32.mrb[12].mxu1 }
 0xa95   : > { %v1678_v36 = vpop.f32.mrb[13].mxu1 }
 0xa96   : > { %v2570_v37 = vpop.f32.mrb[14].mxu1 }
 0xa97   : > { %v1694_v38 = vpack.c.bf16 %v2570_v37, %v2569_v35  ;;  %v1681_v39 = vpop.f32.mrb[15].mxu1  ;;  %v2830_v35 = vld [vmem:[#allocation16 + $0x20] sm:$0xff]   ;;  %v2832_v37 = vld [vmem:[#allocation16 + $0x30] sm:$0xff]  }
 0xa98   : > { %v1693_v40 = vpack.c.bf16 %v1681_v39, %v1678_v36  ;;  %v2831_v36 = vld [vmem:[#allocation16 + $0x28] sm:$0xff]  }
 0xab4   : > { %v2581_v41 = vpop.f32.mrb[16].mxu1 }
 0xab5   : > { %v1782_v42 = vpop.f32.mrb[17].mxu1  ;;  %v1791_v46 = vadd.f32 %v2581_v41, %v3783_v47 }
 0xab6   : > { %v1783_v43 = vadd.f32 %v1782_v42, %v3785_v48  ;;  %v2582_v44 = vpop.f32.mrb[18].mxu1 }
 0xab7   : > { %v1785_v45 = vpop.f32.mrb[19].mxu1  ;;  %v1794_v54 = vadd.f32 %v2582_v44, %v3787_v50  ;;  %v1803_v55 = vsel %vm1156_vm5, %v1791_v46, -inf }
 0xab8   : > { %v1786_v49 = vadd.f32 %v1785_v45, %v3790_v53  ;;  %v1797_v51 = vsel %vm1156_vm5, %v1783_v43, -inf }
 0xab9   : > { %1798 = vmax.xlane.f32.xlu0 %v1797_v51  ;;  %v1806_v56 = vsel %vm1156_vm5, %v1794_v54, -inf }
 0xaba   : > { %v1800_v52 = vsel %vm1156_vm5, %v1786_v49, -inf }
 0xabb   : > { %1801 = vmax.xlane.f32.xlu1 %v1800_v52  ;;  %v2322_v52 = vld [vmem:[%s4162_s7] ss:$0 sm:$0xff] }
 0xabd   : > { %1804 = vmax.xlane.f32.xlu0 %v1803_v55 }
 0xac1   : > { %1807 = vmax.xlane.f32.xlu0 %v1806_v56 }
 0xacc   : > { %1849 = vrot.lane.b32.xlu1 %v3807_v24, %s3252_s29 }
 0xad0   : > { %1851 = vrot.lane.b32.xlu1 %v3811_v25, %s3252_s29 }
 0xb46   : > { %v1799_v47 = vpop.xlane.xlu0 %1798 }
 0xb47   : > { %v1809_v48 = vsub.f32 %v1783_v43, %v1799_v47 }
 0xb48   : > { %v1802_v53 = vpop.xlane.xlu1 %1801 }
 0xb49   : > { %v1813_v59 = vmul.f32 1.442695, %v1809_v48  ;;  %v1810_v60 = vsub.f32 %v1786_v49, %v1802_v53 }
 0xb4a   : > { %v1805_v57 = vpop.xlane.xlu0 %1804 }
 0xb4b   : > { %v1811_v58 = vsub.f32 %v1791_v46, %v1805_v57  ;;  %v1815_v63 = vmul.f32 1.442695, %v1810_v60 }
 0xb4c   : > { %v1850_v18 = vpop.permute.xlu1 %1849 }
 0xb4d   : > { %v1817_v50 = vmul.f32 1.442695, %v1811_v58 }
 0xb4e   : > { %v1808_v61 = vpop.xlane.xlu0 %1807 }
 0xb4f   : > { %2882 = vpow2.f32 %v1817_v50  ;;  %v1812_v62 = vsub.f32 %v1794_v54, %v1808_v61 }
 0xb50   : > { %2884 = vpow2.f32 %v1813_v59  ;;  %v1852_v34 = vpop.permute.xlu1 %1851 }
 0xb51   : > { %v1819_v0 = vmul.f32 1.442695, %v1812_v62 }
 0xb53   : > { %2886 = vpow2.f32 %v1819_v0 }
 0xb54   : > { %2888 = vpow2.f32 %v1815_v63 }
 0xb59   : > { %v2883_v24 = vpop.eup %2882 }
 0xb5a   : > { %v1827_v1 = vsel %vm1156_vm5, %v2883_v24, 0.0  ;;  %v2885_v25 = vpop.eup %2884 }
 0xb5b   : > { %1828 = vadd.xlane.f32.xlu0 %v1827_v1  ;;  %v1821_v7 = vsel %vm1156_vm5, %v2885_v25, 0.0 }
 0xb5d   : > { %v2887_v2 = vpop.eup %2886 }
 0xb5e   : > { %v1830_v8 = vsel %vm1156_vm5, %v2887_v2, 0.0  ;;  %v2889_v3 = vpop.eup %2888 }
 0xb5f   : > { %1822 = vadd.xlane.f32.xlu0 %v1821_v7  ;;  %1831 = vadd.xlane.f32.xlu1 %v1830_v8  ;;  %v1824_v13 = vsel %vm1156_vm5, %v2889_v3, 0.0 }
 0xb63   : > { %1825 = vadd.xlane.f32.xlu1 %v1824_v13 }
 0xb74   : > { %1853 = vrot.lane.b32.xlu1 %v3819_v26, %s3252_s29 }
 0xb75   : > { %1847 = vrot.lane.b32.xlu0 %v3803_v23, %s3252_s29 }
 0xb78   : > { %1478 = vrot.lane.b32.xlu1 %v1473_v15, %s3252_s29 }
 0xb79   : > { %1476 = vrot.lane.b32.xlu0 %v1472_v17, %s3252_s29  ;;  %s3253_s29 = smov [#allocation17]  }
 0xb7a   : > { %s3104_s12 = sshll.u32 %s3253_s29, 4  ;;  %s3105_s12 = int_to_ptr.vmem [resolvable:$false] %s3104_s12 }
 0xb7b   : > { %s3106_s14 = scalar_lea.vmem %s3105_s12, 1024  ;;  %p3107_p11 = scmp.lt.s32.totalorder %s3993_s10, %s3105_s12 }
 0xb7c   : > { %1699 = vrot.lane.b32.xlu1 %v1694_v38, %s3251_s3  ;;  %v2833_v38 = vld [vmem:[#allocation16 + $0x38] sm:$0xff]  }
 0xb7d   : > { %1697 = vrot.lane.b32.xlu0 %v1693_v40, %s3251_s3  ;;  %s3100_s3 = scalar_lea.vmem %s3993_s10, 512 }
 0xb7e   : > { %p3101_p2 = scmp.ne.s32.totalorder %s3993_s10, %s3100_s3  ;;  %p3108_p3 = scmp.lt.s32.totalorder %s3106_s14, %s3100_s3 }
 0xb80   : > { %p3102_p13 = pnand %p3101_p2, %p3632_p0  ;;  %p3109_p6 = por %p3108_p3, %p3107_p11 }
 0xb82   : > { %p3103_p9 = pneg %p3102_p13 }
 0xb84   : > { %p3110_p5 = pnand %p3109_p6, %p3103_p9 }
 0xbe8   : > { %v1829_v26 = vpop.xlane.xlu0 %1828 }
 0xbec   : > { %v1832_v4 = vpop.xlane.xlu1 %1831  ;;  %v1823_v5 = vpop.xlane.xlu0 %1822 }
 0xbed   : > { %2890 = vrcp.f32 %v1832_v4 }
 0xbee   : > { %2892 = vrcp.f32 %v1823_v5 }
 0xbef   : > { %2894 = vrcp.f32 %v1829_v26 }
 0xbf0   : > { %v1826_v23 = vpop.xlane.xlu1 %1825  ;;  %v1848_v11 = vpop.permute.xlu0 %1847 }
 0xbf1   : > { %2896 = vrcp.f32 %v1826_v23  ;;  %2583 = vmatprep.subr.bf16.mxu0 %v1848_v11 }
 0xbf2   : > { %2584 = vmatpush3.bf16.msra.mxu0 %v1848_v11 }
 0xbf3   : > { %2585 = vmatprep.subr.bf16.mxu0 %v1850_v18 }
 0xbf4   : > { %v1854_v12 = vpop.permute.xlu1 %1853  ;;  %v1477_v14 = vpop.permute.xlu0 %1476 }
 0xbf5   : > { %1483 = vst.msk [vmem:[#allocation4] sm:$0xff] %vm1482_vm6, %v1477_v14 }
 0xbf6   : > { %2586 = vmatpush3.bf16.msra.mxu0 %v1850_v18 }
 0xbf7   : > { %2587 = vmatprep.subr.bf16.mxu0 %v1852_v34  ;;  %v2891_v15 = vpop.eup %2890 }
 0xbf8   : > { %v1479_v16 = vpop.permute.xlu1 %1478  ;;  %v1698_v17 = vpop.permute.xlu0 %1697  ;;  %v1840_v10 = vmul.f32 %v2891_v15, %v2887_v2 }
 0xbf9   : > { %v2893_v33 = vpop.eup %2892  ;;  %1484 = vst.msk [vmem:[#allocation4 + $0x8] sm:$0xff] %vm1482_vm6, %v1479_v16 }
 0xbfa   : > { %1704 = vst.msk [vmem:[#allocation4] sm:$0xff] %vm1703_vm7, %v1698_v17  ;;  %v2895_v6 = vpop.eup %2894  ;;  %2588 = vmatpush3.bf16.msra.mxu0 %v1852_v34  ;;  %v1837_v20 = vmul.f32 %v2893_v33, %v2885_v25 }
 0xbfb   : > { %v2897_v9 = vpop.eup %2896  ;;  %2589 = vmatprep.subr.bf16.mxu0 %v1854_v12  ;;  %v1839_v22 = vmul.f32 %v2895_v6, %v2883_v24 }
 0xbfc   : > { %v1700_v19 = vpop.permute.xlu1 %1699  ;;  %v1838_v21 = vmul.f32 %v2897_v9, %v2889_v3 }
 0xbfd   : > { %1705 = vst.msk [vmem:[#allocation4 + $0x8] sm:$0xff] %vm1703_vm7, %v1700_v19  ;;  %v1842_v28 = vpack.c.bf16 %v1840_v10, %v1839_v22 }
 0xbfe   : > { %2590 = vmatpush3.bf16.msra.mxu0 %v1854_v12  ;;  %v1841_v27 = vpack.c.bf16 %v1838_v21, %v1837_v20 }
 0xbff   : > { %2595 = vmatprep.subr.bf16.mxu0 %v2826_v29 }
 0xc00   : > { %2591 = vmatprep.mubr.msk.bf16.mxu0 %vm1156_vm5, %v1841_v27 }
 0xc01   : > { %2592 = vmatmul.mubr.msk.bf16.vlgmr.msra.gmra.mrb[12].mxu0 %vm1156_vm5, %v1842_v28 }
 0xc02   : > { %2596 = vmatpush3.bf16.msra.mxu0 %v2826_v29 }
 0xc03   : > { %2597 = vmatprep.subr.bf16.mxu0 %v2827_v30 }
 0xc06   : > { %2598 = vmatpush3.bf16.msra.mxu0 %v2827_v30 }
 0xc07   : > { %2599 = vmatprep.subr.bf16.mxu0 %v2828_v31 }
 0xc0a   : > { %2600 = vmatpush3.bf16.msra.mxu0 %v2828_v31 }
 0xc0b   : > { %2601 = vmatprep.subr.bf16.mxu0 %v2829_v32 }
 0xc0e   : > { %2602 = vmatpush3.bf16.msra.mxu0 %v2829_v32 }
 0xc0f   : > { %2603 = vmatprep.subr.bf16.mxu0 %v2830_v35 }
 0xc12   : > { %2604 = vmatpush3.bf16.msra.mxu0 %v2830_v35 }
 0xc13   : > { %2605 = vmatprep.subr.bf16.mxu0 %v2831_v36 }
 0xc16   : > { %2606 = vmatpush3.bf16.msra.mxu0 %v2831_v36 }
 0xc17   : > { %2607 = vmatprep.subr.bf16.mxu0 %v2832_v37 }
 0xc1a   : > { %2608 = vmatpush3.bf16.msra.mxu0 %v2832_v37 }
 0xc1b   : > { %2609 = vmatprep.subr.bf16.mxu0 %v2833_v38 }
 0xc1e   : > { %2610 = vmatpush3.bf16.msra.mxu0 %v2833_v38 }
 0xcd4   : > { %v2593_v39 = vpop.f32.mrb[12].mxu0 }
 0xcd5   : > { %v1899_v40 = vpop.f32.mrb[13].mxu0 }
 0xcd6   : > { %v2594_v41 = vpop.f32.mrb[14].mxu0 }
 0xcd7   : > { %v1915_v42 = vpack.c.bf16 %v2594_v41, %v2593_v39  ;;  %v1902_v43 = vpop.f32.mrb[15].mxu0 }
 0xcd8   : > { %v1914_v44 = vpack.c.bf16 %v1902_v43, %v1899_v40 }
 0xcd9   : > { %1920 = vrot.lane.b32.xlu1 %v1915_v42, %s3250_s24 }
 0xcda   : > { %1918 = vrot.lane.b32.xlu0 %v1914_v44, %s3250_s24  ;;  %s2054_s24 = scalar_lea.sflag [#allocation7], %s3710_s4 }
 0xd4b   : > { %v1921_v45 = vpop.permute.xlu1 %1920 }
 0xd4c   : > { %1926 = vst.msk [vmem:[#allocation4 + $0x8] sm:$0xff] %vm1924_vm8, %v1921_v45  ;;  %v1919_v46 = vpop.permute.xlu0 %1918 }
 0xd4d   : > { %1925 = vst.msk [vmem:[#allocation4] sm:$0xff] %vm1924_vm8, %v1919_v46 }
 0xd53   : > { %v1928_v51 = vld [vmem:[#allocation4 + $0x8] sm:$0xff] }
 0xd54   : > { %v1927_v49 = vld [vmem:[#allocation4] sm:$0xff] }
 0xd55   : > { %2611 = vmatprep.mubr.bf16.mxu0 %v1927_v49 }
 0xd56   : > { %2612 = vmatmul.mubr.bf16.vlgmr.msra.gmra.mrb[16].mxu0 %v1928_v51 }
 0xe29   : > { %v2613_v54 = vpop.f32.mrb[16].mxu0 }
 0xe2a   : > { %v2043_v55 = vadd.f32 %v2613_v54, %v2322_v52  ;;  %v2034_v56 = vpop.f32.mrb[17].mxu0 }
 0xe2b   : > { %v2035_v47 = vadd.f32 %v2322_v52, %v2034_v56  ;;  %v2614_v48 = vpop.f32.mrb[18].mxu0 }
 0xe2c   : > { %2051 = vst [vmem:[%s3728_s13 + $0x10] sm:$0xff] %v2043_v55  ;;  %v2046_v53 = vadd.f32 %v2614_v48, %v2322_v52  ;;  %v2037_v57 = vpop.f32.mrb[19].mxu0 }
 0xe2d   : > { %2049 = vst [vmem:[%s3728_s13] sm:$0xff] %v2035_v47  ;;  %v2038_v58 = vadd.f32 %v2322_v52, %v2037_v57 }
 0xe2e   : > { %2052 = vst [vmem:[%s3728_s13 + $0x18] sm:$0xff] %v2046_v53 }
 0xe2f   : > { %2050 = vst [vmem:[%s3728_s13 + $0x8] sm:$0xff] %v2038_v58 }
 0xe30   : > { %3113 = shalt.err (!%p3110_p5)
}
 0xe31   : > { %s3114_s13 = scalar_lea.hbm %s3991_s30, 512  ;;  %s3118_s20 = scalar_lea.hbm %s4163_s15, 2048 }
 0xe32   : > { %p3115_p10 = scmp.ne.s32.totalorder %s3991_s30, %s3114_s13  ;;  %p3119_p4 = scmp.lt.u32.totalorder %s3991_s30, %s4163_s15 }
 0xe33   : > { %p3120_p8 = scmp.lt.u32.totalorder %s3118_s20, %s3114_s13  ;;  %p3122_p2 = scmp.lt.u32.totalorder %s3114_s13, %s3991_s30 }
 0xe34   : > { %p3116_p1 = pnand %p3115_p10, %p3632_p0 }
 0xe35   : > { %p3121_p12 = por %p3120_p8, %p3119_p4 }
 0xe36   : > { %p3117_p7 = pneg %p3116_p1 }
 0xe37   : > { %p3123_p13 = por %p3122_p2, %p3121_p12 }
 0xe39   : > { %p3124_p9 = pnand %p3123_p13, %p3117_p7 }
 0xe3b   : > { %3127 = shalt.err (!%p3124_p9)
}
 0xe3c   : > { %s3254_s11 = smov 128   ;;  %s3255_s8 = smov 8  }
 0xe3d   : > { %2653 = dma.vmem_to_hbm [thread:$0]  (%p3632_p0), %s3993_s10, 512, %s3991_s30, %s2054_s24, %s3254_s11, %s3254_s11, %s3255_s8  }
 0xe3e PF: > { %s4164_s1 = sld [smem:[#allocation24_spill]]  ;;  %s4165_s3 = sld [smem:[#allocation29_spill]] }
 0xe3f   : > { %p2691_p11 = scmp.ge.s32.totalorder %s3238_s27, 2 }
 0xe44   : > { %s2084_s29 = sand.u32 1, %s4164_s1   ;;  %p4166_p3 = scmp.ne.s32.totalorder %s4165_s3, 0 }
 0xe45   : > { %s2085_s12 = scalar_lea.sflag [#allocation7], %s2084_s29 }
 0xe46   : > { %p2679_p6 = pnand %p2691_p11, %p4166_p3 }
 0xe48   : > { %3193 = dma.done.wait (!%p2679_p6), %s2085_s12, 512  }
 0xe49   : > { %3195 = vsyncadd (!%p2679_p6), %s2085_s12, 4294966784  ;;  %s32_s27 = sadd.s32 1, %s3238_s27   ;;  %s4167_s20 = sld [smem:[#allocation25_spill]] }
 0xe4a   : > { %p29_p5 = scmp.ge.s32.totalorder %s32_s27, 6   ;;  %s4168_s4 = smov %s4180_s17 }
 0xe4b   : > { %s4169_s10 = smov %s4184_s23  ;;  %s4170_s17 = smov %s3202_s18 }
 0xe4c   : > { %s4171_s18 = smov %s3206_s19  ;;  %s4172_s19 = smov %s3652_s5 }
 0xe4d   : > { %s4173_s21 = smov %s3218_s22  ;;  %s4174_s22 = smov %s3649_s16 }
 0xe4e   : > { %s4175_s23 = smov %s3230_s25  ;;  %s4176_s24 = smov %s3234_s26 }
 0xe4f   : > { %s4177_s25 = smov %s4168_s4  ;;  %s4178_s26 = smov %s4169_s10 }
 0xe50   :  { %31 = sbr.rel (!%p29_p5) target bundleno = 24 (0x18), region = 153 }
 0xe57   :  { %2090 = vsyncpa [#allocation6], 1 }
 0xe58   :  { %2092 = vsyncpa [#allocation6 + $0x1], 1 }
 0xe59   :  { %2093 = vsyncpa [#allocation9], 1 }
 0xe5a   :  { %2095 = vsyncpa [#allocation9 + $0x1], 1 }
 0xe5b   :  { %2096 = vsyncpa [#allocation12], 1 }
 0xe5c   :  { %2097 = vsyncpa [#allocation15], 1 }
 0xe5d   :  { %2098 = vsyncpa [#allocation7], 1 }
 0xe5e   :  { %2100 = vsyncpa [#allocation7 + $0x1], 1 }

</bundles_post_ra>
